<compile_context>
chip_gen: v6e
topology: v6e:2x2x1
jax: 0.10.0
libtpu: 0.0.40
codegen_flags: <defaults>
</compile_context>

<pallas_src>
import math
import functools

import jax
import jax.numpy as jnp
from jax.experimental import pallas as pl
from jax.experimental.pallas import tpu as pltpu

# ---------------- config constants (stand-ins for cfg.MODEL.WFD.*) ----------------
NUM_CLASSES = 4            # cfg.MODEL.WFD.DECODER.NUM_CLASSES
NUM_ANCHORS = 2            # anchors (A) per width position
FEAT_CH = 32               # encoder feature channels
MATCH_TIMES = 4            # cfg.MODEL.WFD.MATCHER_TOPK
FOCAL_ALPHA = 0.25
FOCAL_GAMMA = 2.0          # loss kernel specialises gamma == 2.0
POS_IGNORE_THRESH = 0.10
NEG_IGNORE_THRESH = 0.70
BBOX_REG_WEIGHTS = (1.0, 1.0)
SCALE_CLAMP = math.log(1000.0 / 16.0)
CTR_CLAMP = 32.0

VMEM = pltpu.MemorySpace.VMEM
SMEM = pltpu.MemorySpace.SMEM


# ---------------- Pallas kernels ----------------
def _head_kernel(x_ref, wbb_ref, bbb_ref, wenc_ref, benc_ref, whead_ref, bhead_ref, o_ref):
    """Fused backbone (linear+relu) -> encoder (linear+relu) -> decoder heads.

    cls / delta weights are pre-concatenated along the output channel axis so the
    whole head is a single matmul with one (lane-denser) output store.
    """
    y = jnp.dot(x_ref[...], wbb_ref[...], preferred_element_type=jnp.float32) + bbb_ref[...]
    y = jnp.maximum(y, 0.0)
    y = jnp.dot(y, wenc_ref[...], preferred_element_type=jnp.float32) + benc_ref[...]
    y = jnp.maximum(y, 0.0)
    o_ref[...] = jnp.dot(y, whead_ref[...], preferred_element_type=jnp.float32) + bhead_ref[...]


def _match_kernel(delta_ref, anch_ref, gt_ref, out_ref,
                  *, wx, ww, scale_clamp, ctr_clamp):
    """Per-image (grid=(B,)) fused matching kernel.

    Computes: delta->box transform, L1(cxcywh) cost of pred boxes vs this image's GT,
    L1(cxcywh) cost of anchors vs GT, anchor-vs-GT pairwise IoU, and per-query max of
    pred-vs-GT IoU.  Only the block-diagonal (Q, M) slabs are ever produced, and the
    five results are packed into a single (Q, 4 + 3*M + 1) output slab (one store).
    """
    d = delta_ref[...]          # (Q, 2) deltas for this image
    a = anch_ref[...]           # (Q, 4) anchors (shared across images)
    gt = gt_ref[...]            # (4, M) this image's GT boxes, transposed (xyxy rows)

    ax0, ay0, ax1, ay1 = a[:, 0:1], a[:, 1:2], a[:, 2:3], a[:, 3:4]     # (Q, 1)
    widths = ax1 - ax0
    ctr = ax0 + 0.5 * widths

    # TODO(synk): exact Box2BoxTransformTrace is not provided; standard 1-D
    # center/width delta transform (with ctr/scale clamps) is used as a stand-in.
    dx = d[:, 0:1] / wx
    dw = d[:, 1:2] / ww
    shift = jnp.clip(dx * widths, -ctr_clamp, ctr_clamp)
    pred_ctr = ctr + shift
    pred_w = jnp.exp(jnp.minimum(dw, scale_clamp)) * widths
    px0 = pred_ctr - 0.5 * pred_w
    px1 = pred_ctr + 0.5 * pred_w
    py0, py1 = ay0, ay1
    pred_box = jnp.concatenate([px0, py0, px1, py1], axis=1)             # (Q, 4)

    gx0, gy0, gx1, gy1 = gt[0:1, :], gt[1:2, :], gt[2:3, :], gt[3:4, :]  # (1, M)
    gcx = (gx0 + gx1) * 0.5
    gcy = (gy0 + gy1) * 0.5
    gw = gx1 - gx0
    gh = gy1 - gy0

    # L1 cxcywh cost: pred boxes vs gt
    pcy = (py0 + py1) * 0.5
    ph = py1 - py0
    cost = (jnp.abs(pred_ctr - gcx) + jnp.abs(pcy - gcy)
            + jnp.abs(pred_w - gw) + jnp.abs(ph - gh))                    # (Q, M)

    # L1 cxcywh cost: anchors vs gt
    acy = (ay0 + ay1) * 0.5
    ah = ay1 - ay0
    cost_a = (jnp.abs(ctr - gcx) + jnp.abs(acy - gcy)
              + jnp.abs(widths - gw) + jnp.abs(ah - gh))                  # (Q, M)

    # pairwise IoU: anchors vs gt
    area_g = gw * gh                                   # (1, M)
    area_a = widths * ah                               # (Q, 1)
    iw = jnp.maximum(jnp.minimum(ax1, gx1) - jnp.maximum(ax0, gx0), 0.0)
    ih = jnp.maximum(jnp.minimum(ay1, gy1) - jnp.maximum(ay0, gy0), 0.0)
    inter = iw * ih
    union = area_a + area_g - inter
    iou_a = inter / union                                                 # (Q, M)

    # pairwise IoU: pred boxes vs gt  -> only the per-query max leaves the kernel
    area_p = pred_w * ph
    iwp = jnp.maximum(jnp.minimum(px1, gx1) - jnp.maximum(px0, gx0), 0.0)
    ihp = jnp.maximum(jnp.minimum(py1, gy1) - jnp.maximum(py0, gy0), 0.0)
    interp = iwp * ihp
    unionp = area_p + area_g - interp
    ioup = interp / unionp
    max_iou = jnp.max(ioup, axis=1, keepdims=True)                        # (Q, 1)

    # single lane-dense store of everything this grid step produced
    out_ref[...] = jnp.concatenate([pred_box, cost, cost_a, iou_a, max_iou], axis=1)


def _loss_kernel(logits_ref, gtcls_ref, pbox_ref, tbox_ref, rmask_ref,
                 out_ref, *, alpha, num_classes):
    """Fused sigmoid focal loss + GIoU box-reg loss + num_fg normalisation.

    Emits one SMEM (2,) vector: [loss_cls, loss_box_reg], both already divided by
    max(1, num_foreground).
    """
    # ---- sigmoid focal loss (gamma == 2.0 specialisation), reduction='sum' over valid rows ----
    x = logits_ref[...]                                    # (B*Q, K)
    gc = gtcls_ref[...]                                    # (B*Q, 1) int32: -1 ignore, K background
    valid = (gc >= 0).astype(jnp.float32)                  # (B*Q, 1)
    fg = jnp.logical_and(gc >= 0, gc != num_classes)       # (B*Q, 1)
    k_iota = jax.lax.broadcasted_iota(jnp.int32, x.shape, 1)
    t = jnp.where(jnp.logical_and(fg, k_iota == gc), 1.0, 0.0)   # one-hot targets on fg rows
    num_fg = jnp.sum(t)                                     # == foreground_idxs.sum()

    p = jax.nn.sigmoid(x)
    ce = jnp.maximum(x, 0.0) - x * t + jnp.log1p(jnp.exp(-jnp.abs(x)))
    p_t = p * t + (1.0 - p) * (1.0 - t)
    one_minus_pt = 1.0 - p_t
    loss = ce * one_minus_pt * one_minus_pt                 # gamma == 2.0 (static)
    a_t = alpha * t + (1.0 - alpha) * (1.0 - t)
    loss_cls = jnp.sum(a_t * loss * valid)

    # ---- GIoU box-reg loss over matched pairs, masked by ~pos_ignore ----
    pb = pbox_ref[...]                                      # (P, 4)
    tb = tbox_ref[...]                                      # (P, 4)
    m = rmask_ref[...]                                      # (P, 1)
    px0, py0, px1, py1 = pb[:, 0:1], pb[:, 1:2], pb[:, 2:3], pb[:, 3:4]
    tx0, ty0, tx1, ty1 = tb[:, 0:1], tb[:, 1:2], tb[:, 2:3], tb[:, 3:4]
    area_p = (px1 - px0) * (py1 - py0)
    area_t = (tx1 - tx0) * (ty1 - ty0)
    iw = jnp.maximum(jnp.minimum(px1, tx1) - jnp.maximum(px0, tx0), 0.0)
    ih = jnp.maximum(jnp.minimum(py1, ty1) - jnp.maximum(py0, ty0), 0.0)
    inter = iw * ih
    union = area_p + area_t - inter
    iou = inter / union
    ew = jnp.maximum(jnp.maximum(px1, tx1) - jnp.minimum(px0, tx0), 0.0)
    eh = jnp.maximum(jnp.maximum(py1, ty1) - jnp.minimum(py0, ty0), 0.0)
    enclose = ew * eh
    giou = iou - (enclose - union) / enclose
    # where() keeps NaN/Inf from masked-out degenerate pairs out of the sum.
    loss_reg = jnp.sum(jnp.where(m > 0.0, 1.0 - giou, 0.0))

    denom = jnp.maximum(1.0, num_fg)
    out_ref[0] = loss_cls / denom
    out_ref[1] = loss_reg / denom


# ---------------- kernel wrappers ----------------
def fused_head(x_cols, params):
    n = x_cols.shape[0]
    c_out = NUM_ANCHORS * NUM_CLASSES + NUM_ANCHORS * 2
    w_head = jnp.concatenate([params["w_cls"], params["w_delta"]], axis=1)
    b_head = jnp.concatenate([params["b_cls"], params["b_delta"]], axis=1)
    return pl.pallas_call(
        _head_kernel,
        out_shape=jax.ShapeDtypeStruct((n, c_out), jnp.float32),
        in_specs=[pl.BlockSpec(memory_space=VMEM)] * 7,
        out_specs=pl.BlockSpec(memory_space=VMEM),
    )(x_cols, params["w_bb"], params["b_bb"], params["w_enc"], params["b_enc"], w_head, b_head)


def fused_match(pred_deltas, anchors, gt_boxes):
    """pred_deltas: (B, Q, 2), anchors: (Q, 4), gt_boxes: (B, M, 4).

    Returns pred_boxes (B,Q,4), cost_bbox (B,Q,M), cost_anchor (B,Q,M),
    iou_anchor (B,Q,M), max_iou (B,Q,1)  -- all sliced from a single packed output.
    """
    B, Q, _ = pred_deltas.shape
    M = gt_boxes.shape[1]
    C = 4 + 3 * M + 1
    gt_t = jnp.swapaxes(gt_boxes, 1, 2)                     # (B, 4, M)
    kern = functools.partial(_match_kernel,
                             wx=BBOX_REG_WEIGHTS[0], ww=BBOX_REG_WEIGHTS[1],
                             scale_clamp=SCALE_CLAMP, ctr_clamp=CTR_CLAMP)
    packed = pl.pallas_call(
        kern,
        grid=(B,),
        out_shape=jax.ShapeDtypeStruct((B, Q, C), jnp.float32),
        in_specs=[pl.BlockSpec((None, Q, 2), lambda i: (i, 0, 0)),
                  pl.BlockSpec((Q, 4), lambda i: (0, 0)),
                  pl.BlockSpec((None, 4, M), lambda i: (i, 0, 0))],
        out_specs=pl.BlockSpec((None, Q, C), lambda i: (i, 0, 0)),
        compiler_params=pltpu.CompilerParams(dimension_semantics=("parallel",)),
    )(pred_deltas, anchors, gt_t)

    pred_boxes = packed[:, :, 0:4]
    cost_bbox = packed[:, :, 4:4 + M]
    cost_anchor = packed[:, :, 4 + M:4 + 2 * M]
    iou_anchor = packed[:, :, 4 + 2 * M:4 + 3 * M]
    max_iou = packed[:, :, 4 + 3 * M:4 + 3 * M + 1]
    return pred_boxes, cost_bbox, cost_anchor, iou_anchor, max_iou


def fused_losses(logits_flat, gt_cls, matched_pred, target_boxes, reg_mask):
    assert FOCAL_GAMMA == 2.0
    kern = functools.partial(_loss_kernel, alpha=FOCAL_ALPHA, num_classes=NUM_CLASSES)
    out = pl.pallas_call(
        kern,
        out_shape=jax.ShapeDtypeStruct((2,), jnp.float32),
        in_specs=[pl.BlockSpec(memory_space=VMEM)] * 5,
        out_specs=pl.BlockSpec(memory_space=SMEM),
    )(logits_flat, gt_cls[:, None].astype(jnp.int32), matched_pred, target_boxes, reg_mask)
    return out[0], out[1]


# ---------------- glue (reshapes, matching bookkeeping) ----------------
def permute_to_N_WA_K(t, K):
    # (N, A*K, W) -> (N, W*A, K), identical to the torch reference
    N, AK, W = t.shape
    t = t.reshape(N, AK // K, K, W)
    t = jnp.transpose(t, (0, 3, 1, 2))
    return t.reshape(N, -1, K)


def make_anchors(W, A):
    sizes = [2.0, 4.0, 8.0][:A]
    rows = []
    for w in range(W):
        for a in range(A):
            c, s = w + 0.5, sizes[a]
            rows.append([c - s / 2.0, 0.0, c + s / 2.0, 1.0])
    return jnp.asarray(rows, jnp.float32)          # (W*A, 4)


def init_params(key, H):
    ks = jax.random.split(key, 4)
    lin = lambda k, shape: 0.1 * jax.random.normal(k, shape, jnp.float32)
    return dict(
        w_bb=lin(ks[0], (H, FEAT_CH)),
        b_bb=jnp.zeros((1, FEAT_CH), jnp.float32),
        w_enc=lin(ks[1], (FEAT_CH, FEAT_CH)),
        b_enc=jnp.zeros((1, FEAT_CH), jnp.float32),
        w_cls=lin(ks[2], (FEAT_CH, NUM_ANCHORS * NUM_CLASSES)),
        b_cls=jnp.full((1, NUM_ANCHORS * NUM_CLASSES), -2.0, jnp.float32),
        w_delta=lin(ks[3], (FEAT_CH, NUM_ANCHORS * 2)),
        b_delta=jnp.zeros((1, NUM_ANCHORS * 2), jnp.float32),
    )


def _topk_smallest_idx(cost, k):
    # cost: (B, Q, M) -> indices of k smallest along Q, shape (B, k, M)
    neg = -jnp.swapaxes(cost, 1, 2)                 # (B, M, Q)
    idx = jax.lax.top_k(neg, k)[1]                  # (B, M, k), smallest-cost first
    return jnp.swapaxes(idx, 1, 2)                  # (B, k, M)


def forward_losses(trace, gt_boxes, gt_classes, params):
    """Training-mode WFDetection.forward -> {'loss_cls', 'loss_box_reg'}."""
    B, _, H, W = trace.shape
    A = NUM_ANCHORS
    K = NUM_CLASSES
    Q = W * A
    M = gt_boxes.shape[1]
    k = MATCH_TIMES
    P = 2 * k * M                                     # matches per image

    # ---- backbone + encoder + decoder (one fused Pallas kernel) ----
    x_cols = jnp.transpose(trace[:, 0], (0, 2, 1)).reshape(B * W, H)     # (B*W, H)
    head_out = fused_head(x_cols, params)                                 # (B*W, A*K + A*2)
    cls_rows = head_out[:, :A * K]
    delta_rows = head_out[:, A * K:]
    box_cls = jnp.transpose(cls_rows.reshape(B, W, A * K), (0, 2, 1))     # (B, A*K, W)
    box_delta = jnp.transpose(delta_rows.reshape(B, W, A * 2), (0, 2, 1)) # (B, A*2, W)
    # box_delta_min / box_delta_max of the reference are unused in the loss path -> dropped.

    pred_logits = permute_to_N_WA_K(box_cls, K)          # (B, Q, K)
    pred_deltas = permute_to_N_WA_K(box_delta, 2)        # (B, Q, 2)

    anchors = make_anchors(W, A)                         # (Q, 4) per-image anchors

    # ---- fused delta-apply + block-diagonal costs + IoUs (grid=(B,)) ----
    pred_boxes, cost_bbox, cost_anchor, iou_anchor, max_iou = fused_match(
        pred_deltas, anchors, gt_boxes)

    # ---- validness_match (top-k smallest cost queries per GT), batched ----
    idx_pred = _topk_smallest_idx(cost_bbox, k)          # (B, k, M)
    idx_anch = _topk_smallest_idx(cost_anchor, k)        # (B, k, M)
    src = jnp.stack([idx_pred, idx_anch], axis=2).reshape(B, P)          # reference hstack order
    tgt = jnp.tile(jnp.arange(M, dtype=jnp.int32), 2 * k)                # (P,)

    # ---- losses bookkeeping ----
    ious = max_iou.reshape(-1)                                           # (B*Q,)
    pos_ious = jax.vmap(lambda io, s: io[s, tgt])(iou_anchor, src).reshape(-1)   # (B*P,)
    ignore_idx = ious > NEG_IGNORE_THRESH
    pos_ignore_idx = pos_ious < POS_IGNORE_THRESH

    src_idx = (src + (jnp.arange(B, dtype=jnp.int32) * Q)[:, None]).reshape(-1)  # (B*P,)
    gt_cls = jnp.where(ignore_idx, -1, jnp.full((B * Q,), K, jnp.int32))
    tgt_cls_o = gt_classes[:, tgt].reshape(-1).astype(jnp.int32)
    tgt_cls_o = jnp.where(pos_ignore_idx, -1, tgt_cls_o)
    # NOTE: with duplicate src indices the winner is unspecified (same as torch index_put).
    gt_cls = gt_cls.at[src_idx].set(tgt_cls_o)

    target_boxes = gt_boxes[:, tgt, :].reshape(B * P, 4)
    matched_pred = pred_boxes.reshape(-1, 4)[src_idx]
    reg_mask = jnp.logical_not(pos_ignore_idx).astype(jnp.float32)[:, None]

    # ---- fused focal + GIoU losses (normalised by max(1, num_fg) in-kernel) ----
    loss_cls, loss_box_reg = fused_losses(
        pred_logits.reshape(-1, K), gt_cls, matched_pred, target_boxes, reg_mask)

    # TODO(synk): inference branch (generalized_batched_nms, Instances postprocess) has no
    # clean Pallas/JAX equivalent here; only the loss-producing forward path is implemented.
    return {"loss_cls": loss_cls, "loss_box_reg": loss_box_reg}


if __name__ == "__main__":
    B, H, W, M = 2, 8, 16, 3
    key = jax.random.PRNGKey(0)
    k_trace, k_cx, k_w, k_cls, k_par = jax.random.split(key, 5)

    trace = jax.random.normal(k_trace, (B, 1, H, W), jnp.float32)        # (N, C=1, H, W)
    cx = jax.random.uniform(k_cx, (B, M), minval=1.0, maxval=W - 1.0)
    bw = jax.random.uniform(k_w, (B, M), minval=1.0, maxval=4.0)
    gt_boxes = jnp.stack([cx - bw / 2.0, jnp.zeros_like(cx),
                          cx + bw / 2.0, jnp.ones_like(cx)], axis=-1)    # (B, M, 4) xyxy
    gt_classes = jax.random.randint(k_cls, (B, M), 0, NUM_CLASSES)

    params = init_params(k_par, H)

    losses = jax.jit(forward_losses)(trace, gt_boxes, gt_classes, params)
    jax.block_until_ready(losses)
    print("KERNEL_OK")
</pallas_src>

<mosaic_0001>
module attributes {stable_mosaic.version = 11 : i64} {
  func.func @_head_kernel(%arg0: memref<32x8xf32, #tpu.memory_space<vmem>>, %arg1: memref<8x32xf32, #tpu.memory_space<vmem>>, %arg2: memref<1x32xf32, #tpu.memory_space<vmem>>, %arg3: memref<32x32xf32, #tpu.memory_space<vmem>>, %arg4: memref<1x32xf32, #tpu.memory_space<vmem>>, %arg5: memref<32x12xf32, #tpu.memory_space<vmem>>, %arg6: memref<1x12xf32, #tpu.memory_space<vmem>>, %arg7: memref<32x12xf32, #tpu.memory_space<vmem>>) attributes {dimension_semantics = [], scalar_prefetch = 0 : i64, scratch_operands = 0 : i64, tpu.core_type = #tpu.core_type<tc>} {
    %c0 = arith.constant 0 : index
    %c0_0 = arith.constant 0 : index
    %0 = vector.load %arg0[%c0, %c0_0] : memref<32x8xf32, #tpu.memory_space<vmem>>, vector<32x8xf32>
    %c0_1 = arith.constant 0 : index
    %c0_2 = arith.constant 0 : index
    %1 = vector.load %arg1[%c0_1, %c0_2] : memref<8x32xf32, #tpu.memory_space<vmem>>, vector<8x32xf32>
    %cst = arith.constant dense<0.000000e+00> : vector<32x32xf32>
    %2 = tpu.matmul %0, %1, %cst {dimension_numbers = #tpu.dot_dimension_numbers<[1], [0], [0], [1], [0, 0, 1, 1], [], []>} : vector<32x8xf32>, vector<8x32xf32>, vector<32x32xf32> -> vector<32x32xf32>
    %c0_3 = arith.constant 0 : index
    %c0_4 = arith.constant 0 : index
    %3 = vector.load %arg2[%c0_3, %c0_4] : memref<1x32xf32, #tpu.memory_space<vmem>>, vector<1x32xf32>
    %4 = vector.broadcast %3 : vector<1x32xf32> to vector<32x32xf32>
    %5 = arith.addf %2, %4 : vector<32x32xf32>
    %cst_5 = arith.constant 0.000000e+00 : f32
    %6 = vector.broadcast %cst_5 : f32 to vector<32x32xf32>
    %7 = arith.maximumf %5, %6 : vector<32x32xf32>
    %c0_6 = arith.constant 0 : index
    %c0_7 = arith.constant 0 : index
    %8 = vector.load %arg3[%c0_6, %c0_7] : memref<32x32xf32, #tpu.memory_space<vmem>>, vector<32x32xf32>
    %cst_8 = arith.constant dense<0.000000e+00> : vector<32x32xf32>
    %9 = tpu.matmul %7, %8, %cst_8 {dimension_numbers = #tpu.dot_dimension_numbers<[1], [0], [0], [1], [0, 0, 1, 1], [], []>} : vector<32x32xf32>, vector<32x32xf32>, vector<32x32xf32> -> vector<32x32xf32>
    %c0_9 = arith.constant 0 : index
    %c0_10 = arith.constant 0 : index
    %10 = vector.load %arg4[%c0_9, %c0_10] : memref<1x32xf32, #tpu.memory_space<vmem>>, vector<1x32xf32>
    %11 = vector.broadcast %10 : vector<1x32xf32> to vector<32x32xf32>
    %12 = arith.addf %9, %11 : vector<32x32xf32>
    %cst_11 = arith.constant 0.000000e+00 : f32
    %13 = vector.broadcast %cst_11 : f32 to vector<32x32xf32>
    %14 = arith.maximumf %12, %13 : vector<32x32xf32>
    %c0_12 = arith.constant 0 : index
    %c0_13 = arith.constant 0 : index
    %15 = vector.load %arg5[%c0_12, %c0_13] : memref<32x12xf32, #tpu.memory_space<vmem>>, vector<32x12xf32>
    %cst_14 = arith.constant dense<0.000000e+00> : vector<32x12xf32>
    %16 = tpu.matmul %14, %15, %cst_14 {dimension_numbers = #tpu.dot_dimension_numbers<[1], [0], [0], [1], [0, 0, 1, 1], [], []>} : vector<32x32xf32>, vector<32x12xf32>, vector<32x12xf32> -> vector<32x12xf32>
    %c0_15 = arith.constant 0 : index
    %c0_16 = arith.constant 0 : index
    %17 = vector.load %arg6[%c0_15, %c0_16] : memref<1x12xf32, #tpu.memory_space<vmem>>, vector<1x12xf32>
    %18 = vector.broadcast %17 : vector<1x12xf32> to vector<32x12xf32>
    %19 = arith.addf %16, %18 : vector<32x12xf32>
    %c0_17 = arith.constant 0 : index
    %c0_18 = arith.constant 0 : index
    %20 = vector.load %arg7[%c0_17, %c0_18] : memref<32x12xf32, #tpu.memory_space<vmem>>, vector<32x12xf32>
    tpu.vector_store %arg7[%c0_17, %c0_18], %19 {strides = array<i32>} : memref<32x12xf32, #tpu.memory_space<vmem>>, vector<32x12xf32>,
    return
  }
}

module attributes {stable_mosaic.version = 11 : i64} {
  func.func @_match_kernel(%arg0: i32, %arg1: memref<1x32x2xf32, #tpu.memory_space<vmem>>, %arg2: memref<32x4xf32, #tpu.memory_space<vmem>>, %arg3: memref<1x4x3xf32, #tpu.memory_space<vmem>>, %arg4: memref<1x32x14xf32, #tpu.memory_space<vmem>>) attributes {dimension_semantics = [#tpu.dimension_semantics<parallel>], iteration_bounds = array<i64: 2>, scalar_prefetch = 0 : i64, scratch_operands = 0 : i64, tpu.core_type = #tpu.core_type<tc>, window_params = [{transform_indices = @transform_0, window_bounds = array<i64: 1, 32, 2>}, {pipeline_mode = #tpu.pipeline_mode<synchronous>, transform_indices = @transform_1, window_bounds = array<i64: 32, 4>}, {transform_indices = @transform_2, window_bounds = array<i64: 1, 4, 3>}, {transform_indices = @transform_3, window_bounds = array<i64: 1, 32, 14>}]} {
    %c0 = arith.constant 0 : index
    %c0_0 = arith.constant 0 : index
    %c0_1 = arith.constant 0 : index
    %0 = vector.load %arg1[%c0, %c0_0, %c0_1] : memref<1x32x2xf32, #tpu.memory_space<vmem>>, vector<1x32x2xf32>
    %1 = vector.shape_cast %0 : vector<1x32x2xf32> to vector<32x2xf32>
    %c0_2 = arith.constant 0 : index
    %c0_3 = arith.constant 0 : index
    %2 = vector.load %arg2[%c0_2, %c0_3] : memref<32x4xf32, #tpu.memory_space<vmem>>, vector<32x4xf32>
    %c0_4 = arith.constant 0 : index
    %c0_5 = arith.constant 0 : index
    %c0_6 = arith.constant 0 : index
    %3 = vector.load %arg3[%c0_4, %c0_5, %c0_6] : memref<1x4x3xf32, #tpu.memory_space<vmem>>, vector<1x4x3xf32>
    %4 = vector.shape_cast %3 : vector<1x4x3xf32> to vector<4x3xf32>
    %5 = vector.extract_strided_slice %2 {offsets = [0, 0], sizes = [32, 1], strides = [1, 1]} : vector<32x4xf32> to vector<32x1xf32>
    %6 = vector.extract_strided_slice %2 {offsets = [0, 1], sizes = [32, 1], strides = [1, 1]} : vector<32x4xf32> to vector<32x1xf32>
    %7 = vector.extract_strided_slice %2 {offsets = [0, 2], sizes = [32, 1], strides = [1, 1]} : vector<32x4xf32> to vector<32x1xf32>
    %8 = vector.extract_strided_slice %2 {offsets = [0, 3], sizes = [32, 1], strides = [1, 1]} : vector<32x4xf32> to vector<32x1xf32>
    %9 = arith.subf %7, %5 : vector<32x1xf32>
    %cst = arith.constant 5.000000e-01 : f32
    %10 = vector.broadcast %cst : f32 to vector<32x1xf32>
    %11 = arith.mulf %10, %9 : vector<32x1xf32>
    %12 = arith.addf %5, %11 : vector<32x1xf32>
    %13 = vector.extract_strided_slice %1 {offsets = [0, 0], sizes = [32, 1], strides = [1, 1]} : vector<32x2xf32> to vector<32x1xf32>
    %cst_7 = arith.constant 1.000000e+00 : f32
    %14 = vector.broadcast %cst_7 : f32 to vector<32x1xf32>
    %15 = arith.divf %13, %14 : vector<32x1xf32>
    %16 = vector.extract_strided_slice %1 {offsets = [0, 1], sizes = [32, 1], strides = [1, 1]} : vector<32x2xf32> to vector<32x1xf32>
    %cst_8 = arith.constant 1.000000e+00 : f32
    %17 = vector.broadcast %cst_8 : f32 to vector<32x1xf32>
    %18 = arith.divf %16, %17 : vector<32x1xf32>
    %19 = arith.mulf %15, %9 : vector<32x1xf32>
    %cst_9 = arith.constant -3.200000e+01 : f32
    %cst_10 = arith.constant 3.200000e+01 : f32
    %20 = vector.broadcast %cst_9 : f32 to vector<32x1xf32>
    %21 = arith.maximumf %20, %19 : vector<32x1xf32>
    %22 = vector.broadcast %cst_10 : f32 to vector<32x1xf32>
    %23 = arith.minimumf %22, %21 : vector<32x1xf32>
    %24 = arith.addf %12, %23 : vector<32x1xf32>
    %cst_11 = arith.constant 4.13516665 : f32
    %25 = vector.broadcast %cst_11 : f32 to vector<32x1xf32>
    %26 = arith.minimumf %18, %25 : vector<32x1xf32>
    %27 = math.exp %26 : vector<32x1xf32>
    %28 = arith.mulf %27, %9 : vector<32x1xf32>
    %cst_12 = arith.constant 5.000000e-01 : f32
    %29 = vector.broadcast %cst_12 : f32 to vector<32x1xf32>
    %30 = arith.mulf %29, %28 : vector<32x1xf32>
    %31 = arith.subf %24, %30 : vector<32x1xf32>
    %cst_13 = arith.constant 5.000000e-01 : f32
    %32 = vector.broadcast %cst_13 : f32 to vector<32x1xf32>
    %33 = arith.mulf %32, %28 : vector<32x1xf32>
    %34 = arith.addf %24, %33 : vector<32x1xf32>
    %35 = tpu.concatenate %31, %6, %34, %8 in 1 : vector<32x1xf32>, vector<32x1xf32>, vector<32x1xf32>, vector<32x1xf32> -> vector<32x4xf32>
    %36 = vector.extract_strided_slice %4 {offsets = [0, 0], sizes = [1, 3], strides = [1, 1]} : vector<4x3xf32> to vector<1x3xf32>
    %37 = vector.extract_strided_slice %4 {offsets = [1, 0], sizes = [1, 3], strides = [1, 1]} : vector<4x3xf32> to vector<1x3xf32>
    %38 = vector.extract_strided_slice %4 {offsets = [2, 0], sizes = [1, 3], strides = [1, 1]} : vector<4x3xf32> to vector<1x3xf32>
    %39 = vector.extract_strided_slice %4 {offsets = [3, 0], sizes = [1, 3], strides = [1, 1]} : vector<4x3xf32> to vector<1x3xf32>
    %40 = arith.addf %36, %38 : vector<1x3xf32>
    %cst_14 = arith.constant 5.000000e-01 : f32
    %41 = vector.broadcast %cst_14 : f32 to vector<1x3xf32>
    %42 = arith.mulf %40, %41 : vector<1x3xf32>
    %43 = arith.addf %37, %39 : vector<1x3xf32>
    %cst_15 = arith.constant 5.000000e-01 : f32
    %44 = vector.broadcast %cst_15 : f32 to vector<1x3xf32>
    %45 = arith.mulf %43, %44 : vector<1x3xf32>
    %46 = arith.subf %38, %36 : vector<1x3xf32>
    %47 = arith.subf %39, %37 : vector<1x3xf32>
    %48 = arith.addf %6, %8 : vector<32x1xf32>
    %cst_16 = arith.constant 5.000000e-01 : f32
    %49 = vector.broadcast %cst_16 : f32 to vector<32x1xf32>
    %50 = arith.mulf %48, %49 : vector<32x1xf32>
    %51 = arith.subf %8, %6 : vector<32x1xf32>
    %52 = vector.broadcast %24 : vector<32x1xf32> to vector<32x3xf32>
    %53 = vector.broadcast %42 : vector<1x3xf32> to vector<32x3xf32>
    %54 = arith.subf %52, %53 : vector<32x3xf32>
    %55 = math.absf %54 : vector<32x3xf32>
    %56 = vector.broadcast %50 : vector<32x1xf32> to vector<32x3xf32>
    %57 = vector.broadcast %45 : vector<1x3xf32> to vector<32x3xf32>
    %58 = arith.subf %56, %57 : vector<32x3xf32>
    %59 = math.absf %58 : vector<32x3xf32>
    %60 = arith.addf %55, %59 : vector<32x3xf32>
    %61 = vector.broadcast %28 : vector<32x1xf32> to vector<32x3xf32>
    %62 = vector.broadcast %46 : vector<1x3xf32> to vector<32x3xf32>
    %63 = arith.subf %61, %62 : vector<32x3xf32>
    %64 = math.absf %63 : vector<32x3xf32>
    %65 = arith.addf %60, %64 : vector<32x3xf32>
    %66 = vector.broadcast %51 : vector<32x1xf32> to vector<32x3xf32>
    %67 = vector.broadcast %47 : vector<1x3xf32> to vector<32x3xf32>
    %68 = arith.subf %66, %67 : vector<32x3xf32>
    %69 = math.absf %68 : vector<32x3xf32>
    %70 = arith.addf %65, %69 : vector<32x3xf32>
    %71 = arith.addf %6, %8 : vector<32x1xf32>
    %cst_17 = arith.constant 5.000000e-01 : f32
    %72 = vector.broadcast %cst_17 : f32 to vector<32x1xf32>
    %73 = arith.mulf %71, %72 : vector<32x1xf32>
    %74 = arith.subf %8, %6 : vector<32x1xf32>
    %75 = vector.broadcast %12 : vector<32x1xf32> to vector<32x3xf32>
    %76 = vector.broadcast %42 : vector<1x3xf32> to vector<32x3xf32>
    %77 = arith.subf %75, %76 : vector<32x3xf32>
    %78 = math.absf %77 : vector<32x3xf32>
    %79 = vector.broadcast %73 : vector<32x1xf32> to vector<32x3xf32>
    %80 = vector.broadcast %45 : vector<1x3xf32> to vector<32x3xf32>
    %81 = arith.subf %79, %80 : vector<32x3xf32>
    %82 = math.absf %81 : vector<32x3xf32>
    %83 = arith.addf %78, %82 : vector<32x3xf32>
    %84 = vector.broadcast %9 : vector<32x1xf32> to vector<32x3xf32>
    %85 = vector.broadcast %46 : vector<1x3xf32> to vector<32x3xf32>
    %86 = arith.subf %84, %85 : vector<32x3xf32>
    %87 = math.absf %86 : vector<32x3xf32>
    %88 = arith.addf %83, %87 : vector<32x3xf32>
    %89 = vector.broadcast %74 : vector<32x1xf32> to vector<32x3xf32>
    %90 = vector.broadcast %47 : vector<1x3xf32> to vector<32x3xf32>
    %91 = arith.subf %89, %90 : vector<32x3xf32>
    %92 = math.absf %91 : vector<32x3xf32>
    %93 = arith.addf %88, %92 : vector<32x3xf32>
    %94 = arith.mulf %46, %47 : vector<1x3xf32>
    %95 = arith.mulf %9, %74 : vector<32x1xf32>
    %96 = vector.broadcast %7 : vector<32x1xf32> to vector<32x3xf32>
    %97 = vector.broadcast %38 : vector<1x3xf32> to vector<32x3xf32>
    %98 = arith.minimumf %96, %97 : vector<32x3xf32>
    %99 = vector.broadcast %5 : vector<32x1xf32> to vector<32x3xf32>
    %100 = vector.broadcast %36 : vector<1x3xf32> to vector<32x3xf32>
    %101 = arith.maximumf %99, %100 : vector<32x3xf32>
    %102 = arith.subf %98, %101 : vector<32x3xf32>
    %cst_18 = arith.constant 0.000000e+00 : f32
    %103 = vector.broadcast %cst_18 : f32 to vector<32x3xf32>
    %104 = arith.maximumf %102, %103 : vector<32x3xf32>
    %105 = vector.broadcast %8 : vector<32x1xf32> to vector<32x3xf32>
    %106 = vector.broadcast %39 : vector<1x3xf32> to vector<32x3xf32>
    %107 = arith.minimumf %105, %106 : vector<32x3xf32>
    %108 = vector.broadcast %6 : vector<32x1xf32> to vector<32x3xf32>
    %109 = vector.broadcast %37 : vector<1x3xf32> to vector<32x3xf32>
    %110 = arith.maximumf %108, %109 : vector<32x3xf32>
    %111 = arith.subf %107, %110 : vector<32x3xf32>
    %cst_19 = arith.constant 0.000000e+00 : f32
    %112 = vector.broadcast %cst_19 : f32 to vector<32x3xf32>
    %113 = arith.maximumf %111, %112 : vector<32x3xf32>
    %114 = arith.mulf %104, %113 : vector<32x3xf32>
    %115 = vector.broadcast %95 : vector<32x1xf32> to vector<32x3xf32>
    %116 = vector.broadcast %94 : vector<1x3xf32> to vector<32x3xf32>
    %117 = arith.addf %115, %116 : vector<32x3xf32>
    %118 = arith.subf %117, %114 : vector<32x3xf32>
    %119 = arith.divf %114, %118 : vector<32x3xf32>
    %120 = arith.mulf %28, %51 : vector<32x1xf32>
    %121 = vector.broadcast %34 : vector<32x1xf32> to vector<32x3xf32>
    %122 = vector.broadcast %38 : vector<1x3xf32> to vector<32x3xf32>
    %123 = arith.minimumf %121, %122 : vector<32x3xf32>
    %124 = vector.broadcast %31 : vector<32x1xf32> to vector<32x3xf32>
    %125 = vector.broadcast %36 : vector<1x3xf32> to vector<32x3xf32>
    %126 = arith.maximumf %124, %125 : vector<32x3xf32>
    %127 = arith.subf %123, %126 : vector<32x3xf32>
    %cst_20 = arith.constant 0.000000e+00 : f32
    %128 = vector.broadcast %cst_20 : f32 to vector<32x3xf32>
    %129 = arith.maximumf %127, %128 : vector<32x3xf32>
    %130 = vector.broadcast %8 : vector<32x1xf32> to vector<32x3xf32>
    %131 = vector.broadcast %39 : vector<1x3xf32> to vector<32x3xf32>
    %132 = arith.minimumf %130, %131 : vector<32x3xf32>
    %133 = vector.broadcast %6 : vector<32x1xf32> to vector<32x3xf32>
    %134 = vector.broadcast %37 : vector<1x3xf32> to vector<32x3xf32>
    %135 = arith.maximumf %133, %134 : vector<32x3xf32>
    %136 = arith.subf %132, %135 : vector<32x3xf32>
    %cst_21 = arith.constant 0.000000e+00 : f32
    %137 = vector.broadcast %cst_21 : f32 to vector<32x3xf32>
    %138 = arith.maximumf %136, %137 : vector<32x3xf32>
    %139 = arith.mulf %129, %138 : vector<32x3xf32>
    %140 = vector.broadcast %120 : vector<32x1xf32> to vector<32x3xf32>
    %141 = vector.broadcast %94 : vector<1x3xf32> to vector<32x3xf32>
    %142 = arith.addf %140, %141 : vector<32x3xf32>
    %143 = arith.subf %142, %139 : vector<32x3xf32>
    %144 = arith.divf %139, %143 : vector<32x3xf32>
    %cst_22 = arith.constant dense<0xFF800000> : vector<32xf32>
    %145 = vector.multi_reduction <maximumf>, %144, %cst_22 [1] : vector<32x3xf32> to vector<32xf32>
    %146 = vector.shape_cast %145 : vector<32xf32> to vector<32x1xf32>
    %147 = tpu.concatenate %35, %70, %93, %119, %146 in 1 : vector<32x4xf32>, vector<32x3xf32>, vector<32x3xf32>, vector<32x3xf32>, vector<32x1xf32> -> vector<32x14xf32>
    %c0_23 = arith.constant 0 : index
    %c0_24 = arith.constant 0 : index
    %c0_25 = arith.constant 0 : index
    %148 = vector.load %arg4[%c0_23, %c0_24, %c0_25] : memref<1x32x14xf32, #tpu.memory_space<vmem>>, vector<1x32x14xf32>
    %149 = vector.shape_cast %148 : vector<1x32x14xf32> to vector<32x14xf32>
    %150 = vector.shape_cast %147 : vector<32x14xf32> to vector<1x32x14xf32>
    tpu.vector_store %arg4[%c0_23, %c0_24, %c0_25], %150 {strides = array<i32>} : memref<1x32x14xf32, #tpu.memory_space<vmem>>, vector<1x32x14xf32>,
    return
  }
  func.func @transform_0(%arg0: i32) -> (i32, i32, i32) {
    %c0_i32 = arith.constant 0 : i32
    %c0_i32_0 = arith.constant 0 : i32
    %c0_i32_1 = arith.constant 0 : i32
    return %arg0, %c0_i32, %c0_i32_0 : i32, i32, i32
  }
  func.func @transform_1(%arg0: i32) -> (i32, i32) {
    %c0_i32 = arith.constant 0 : i32
    %c0_i32_0 = arith.constant 0 : i32
    %c0_i32_1 = arith.constant 0 : i32
    return %c0_i32, %c0_i32_0 : i32, i32
  }
  func.func @transform_2(%arg0: i32) -> (i32, i32, i32) {
    %c0_i32 = arith.constant 0 : i32
    %c0_i32_0 = arith.constant 0 : i32
    %c0_i32_1 = arith.constant 0 : i32
    return %arg0, %c0_i32, %c0_i32_0 : i32, i32, i32
  }
  func.func @transform_3(%arg0: i32) -> (i32, i32, i32) {
    %c0_i32 = arith.constant 0 : i32
    %c0_i32_0 = arith.constant 0 : i32
    %c0_i32_1 = arith.constant 0 : i32
    return %arg0, %c0_i32, %c0_i32_0 : i32, i32, i32
  }
}

module attributes {stable_mosaic.version = 11 : i64} {
  func.func @_loss_kernel(%arg0: memref<64x4xf32, #tpu.memory_space<vmem>>, %arg1: memref<64x1xi32, #tpu.memory_space<vmem>>, %arg2: memref<48x4xf32, #tpu.memory_space<vmem>>, %arg3: memref<48x4xf32, #tpu.memory_space<vmem>>, %arg4: memref<48x1xf32, #tpu.memory_space<vmem>>, %arg5: memref<2xf32, #tpu.memory_space<smem>>) attributes {dimension_semantics = [], scalar_prefetch = 0 : i64, scratch_operands = 0 : i64, tpu.core_type = #tpu.core_type<tc>} {
    %c0 = arith.constant 0 : index
    %c0_0 = arith.constant 0 : index
    %0 = vector.load %arg0[%c0, %c0_0] : memref<64x4xf32, #tpu.memory_space<vmem>>, vector<64x4xf32>
    %c0_1 = arith.constant 0 : index
    %c0_2 = arith.constant 0 : index
    %1 = vector.load %arg1[%c0_1, %c0_2] : memref<64x1xi32, #tpu.memory_space<vmem>>, vector<64x1xi32>
    %c0_i32 = arith.constant 0 : i32
    %2 = vector.broadcast %c0_i32 : i32 to vector<64x1xi32>
    %3 = arith.cmpi sge, %1, %2 : vector<64x1xi32>
    %4 = arith.extui %3 : vector<64x1xi1> to vector<64x1xi32>
    %5 = arith.sitofp %4 : vector<64x1xi32> to vector<64x1xf32>
    %c0_i32_3 = arith.constant 0 : i32
    %6 = vector.broadcast %c0_i32_3 : i32 to vector<64x1xi32>
    %7 = arith.cmpi sge, %1, %6 : vector<64x1xi32>
    %c4_i32 = arith.constant 4 : i32
    %8 = vector.broadcast %c4_i32 : i32 to vector<64x1xi32>
    %9 = arith.cmpi ne, %1, %8 : vector<64x1xi32>
    %10 = arith.andi %7, %9 : vector<64x1xi1>
    %11 = tpu.iota {dimensions = array<i32: 1>} : vector<64x4xi32>
    %12 = vector.broadcast %1 : vector<64x1xi32> to vector<64x4xi32>
    %13 = arith.cmpi eq, %11, %12 : vector<64x4xi32>
    %14 = vector.broadcast %10 : vector<64x1xi1> to vector<64x4xi1>
    %15 = arith.andi %14, %13 : vector<64x4xi1>
    %cst = arith.constant 1.000000e+00 : f32
    %cst_4 = arith.constant 0.000000e+00 : f32
    %16 = vector.broadcast %cst : f32 to vector<64x4xf32>
    %17 = vector.broadcast %cst_4 : f32 to vector<64x4xf32>
    %18 = arith.select %15, %16, %17 : vector<64x4xi1>, vector<64x4xf32>
    %19 = vector.shape_cast %18 : vector<64x4xf32> to vector<1x64x4xf32>
    %cst_5 = arith.constant dense<0.000000e+00> : vector<1xf32>
    %20 = vector.multi_reduction <add>, %19, %cst_5 [1, 2] : vector<1x64x4xf32> to vector<1xf32>
    %21 = vector.shape_cast %20 : vector<1xf32> to vector<1x1x1xf32>
    %22 = vector.extract %21[0, 0, 0] : f32 from vector<1x1x1xf32>
    %23 = arith.negf %0 : vector<64x4xf32>
    %24 = math.exp %23 : vector<64x4xf32>
    %cst_6 = arith.constant 1.000000e+00 : f32
    %25 = vector.broadcast %cst_6 : f32 to vector<64x4xf32>
    %26 = arith.addf %25, %24 : vector<64x4xf32>
    %27 = arith.divf %25, %26 : vector<64x4xf32>
    %cst_7 = arith.constant 0.000000e+00 : f32
    %28 = vector.broadcast %cst_7 : f32 to vector<64x4xf32>
    %29 = arith.maximumf %0, %28 : vector<64x4xf32>
    %30 = arith.mulf %0, %18 : vector<64x4xf32>
    %31 = arith.subf %29, %30 : vector<64x4xf32>
    %32 = math.absf %0 : vector<64x4xf32>
    %cst_8 = arith.constant 0.000000e+00 : f32
    %33 = vector.broadcast %cst_8 : f32 to vector<64x4xf32>
    %34 = arith.subf %33, %32 : vector<64x4xf32>
    %35 = math.exp %34 : vector<64x4xf32>
    %36 = math.log1p %35 : vector<64x4xf32>
    %37 = arith.addf %31, %36 : vector<64x4xf32>
    %38 = arith.mulf %27, %18 : vector<64x4xf32>
    %cst_9 = arith.constant 1.000000e+00 : f32
    %39 = vector.broadcast %cst_9 : f32 to vector<64x4xf32>
    %40 = arith.subf %39, %27 : vector<64x4xf32>
    %cst_10 = arith.constant 1.000000e+00 : f32
    %41 = vector.broadcast %cst_10 : f32 to vector<64x4xf32>
    %42 = arith.subf %41, %18 : vector<64x4xf32>
    %43 = arith.mulf %40, %42 : vector<64x4xf32>
    %44 = arith.addf %38, %43 : vector<64x4xf32>
    %cst_11 = arith.constant 1.000000e+00 : f32
    %45 = vector.broadcast %cst_11 : f32 to vector<64x4xf32>
    %46 = arith.subf %45, %44 : vector<64x4xf32>
    %47 = arith.mulf %37, %46 : vector<64x4xf32>
    %48 = arith.mulf %47, %46 : vector<64x4xf32>
    %cst_12 = arith.constant 2.500000e-01 : f32
    %49 = vector.broadcast %cst_12 : f32 to vector<64x4xf32>
    %50 = arith.mulf %49, %18 : vector<64x4xf32>
    %cst_13 = arith.constant 1.000000e+00 : f32
    %51 = vector.broadcast %cst_13 : f32 to vector<64x4xf32>
    %52 = arith.subf %51, %18 : vector<64x4xf32>
    %cst_14 = arith.constant 7.500000e-01 : f32
    %53 = vector.broadcast %cst_14 : f32 to vector<64x4xf32>
    %54 = arith.mulf %53, %52 : vector<64x4xf32>
    %55 = arith.addf %50, %54 : vector<64x4xf32>
    %56 = arith.mulf %55, %48 : vector<64x4xf32>
    %57 = vector.broadcast %5 : vector<64x1xf32> to vector<64x4xf32>
    %58 = arith.mulf %56, %57 : vector<64x4xf32>
    %59 = vector.shape_cast %58 : vector<64x4xf32> to vector<1x64x4xf32>
    %cst_15 = arith.constant dense<0.000000e+00> : vector<1xf32>
    %60 = vector.multi_reduction <add>, %59, %cst_15 [1, 2] : vector<1x64x4xf32> to vector<1xf32>
    %61 = vector.shape_cast %60 : vector<1xf32> to vector<1x1x1xf32>
    %62 = vector.extract %61[0, 0, 0] : f32 from vector<1x1x1xf32>
    %c0_16 = arith.constant 0 : index
    %c0_17 = arith.constant 0 : index
    %63 = vector.load %arg2[%c0_16, %c0_17] : memref<48x4xf32, #tpu.memory_space<vmem>>, vector<48x4xf32>
    %c0_18 = arith.constant 0 : index
    %c0_19 = arith.constant 0 : index
    %64 = vector.load %arg3[%c0_18, %c0_19] : memref<48x4xf32, #tpu.memory_space<vmem>>, vector<48x4xf32>
    %c0_20 = arith.constant 0 : index
    %c0_21 = arith.constant 0 : index
    %65 = vector.load %arg4[%c0_20, %c0_21] : memref<48x1xf32, #tpu.memory_space<vmem>>, vector<48x1xf32>
    %66 = vector.extract_strided_slice %63 {offsets = [0, 0], sizes = [48, 1], strides = [1, 1]} : vector<48x4xf32> to vector<48x1xf32>
    %67 = vector.extract_strided_slice %63 {offsets = [0, 1], sizes = [48, 1], strides = [1, 1]} : vector<48x4xf32> to vector<48x1xf32>
    %68 = vector.extract_strided_slice %63 {offsets = [0, 2], sizes = [48, 1], strides = [1, 1]} : vector<48x4xf32> to vector<48x1xf32>
    %69 = vector.extract_strided_slice %63 {offsets = [0, 3], sizes = [48, 1], strides = [1, 1]} : vector<48x4xf32> to vector<48x1xf32>
    %70 = vector.extract_strided_slice %64 {offsets = [0, 0], sizes = [48, 1], strides = [1, 1]} : vector<48x4xf32> to vector<48x1xf32>
    %71 = vector.extract_strided_slice %64 {offsets = [0, 1], sizes = [48, 1], strides = [1, 1]} : vector<48x4xf32> to vector<48x1xf32>
    %72 = vector.extract_strided_slice %64 {offsets = [0, 2], sizes = [48, 1], strides = [1, 1]} : vector<48x4xf32> to vector<48x1xf32>
    %73 = vector.extract_strided_slice %64 {offsets = [0, 3], sizes = [48, 1], strides = [1, 1]} : vector<48x4xf32> to vector<48x1xf32>
    %74 = arith.subf %68, %66 : vector<48x1xf32>
    %75 = arith.subf %69, %67 : vector<48x1xf32>
    %76 = arith.mulf %74, %75 : vector<48x1xf32>
    %77 = arith.subf %72, %70 : vector<48x1xf32>
    %78 = arith.subf %73, %71 : vector<48x1xf32>
    %79 = arith.mulf %77, %78 : vector<48x1xf32>
    %80 = arith.minimumf %68, %72 : vector<48x1xf32>
    %81 = arith.maximumf %66, %70 : vector<48x1xf32>
    %82 = arith.subf %80, %81 : vector<48x1xf32>
    %cst_22 = arith.constant 0.000000e+00 : f32
    %83 = vector.broadcast %cst_22 : f32 to vector<48x1xf32>
    %84 = arith.maximumf %82, %83 : vector<48x1xf32>
    %85 = arith.minimumf %69, %73 : vector<48x1xf32>
    %86 = arith.maximumf %67, %71 : vector<48x1xf32>
    %87 = arith.subf %85, %86 : vector<48x1xf32>
    %cst_23 = arith.constant 0.000000e+00 : f32
    %88 = vector.broadcast %cst_23 : f32 to vector<48x1xf32>
    %89 = arith.maximumf %87, %88 : vector<48x1xf32>
    %90 = arith.mulf %84, %89 : vector<48x1xf32>
    %91 = arith.addf %76, %79 : vector<48x1xf32>
    %92 = arith.subf %91, %90 : vector<48x1xf32>
    %93 = arith.divf %90, %92 : vector<48x1xf32>
    %94 = arith.maximumf %68, %72 : vector<48x1xf32>
    %95 = arith.minimumf %66, %70 : vector<48x1xf32>
    %96 = arith.subf %94, %95 : vector<48x1xf32>
    %cst_24 = arith.constant 0.000000e+00 : f32
    %97 = vector.broadcast %cst_24 : f32 to vector<48x1xf32>
    %98 = arith.maximumf %96, %97 : vector<48x1xf32>
    %99 = arith.maximumf %69, %73 : vector<48x1xf32>
    %100 = arith.minimumf %67, %71 : vector<48x1xf32>
    %101 = arith.subf %99, %100 : vector<48x1xf32>
    %cst_25 = arith.constant 0.000000e+00 : f32
    %102 = vector.broadcast %cst_25 : f32 to vector<48x1xf32>
    %103 = arith.maximumf %101, %102 : vector<48x1xf32>
    %104 = arith.mulf %98, %103 : vector<48x1xf32>
    %105 = arith.subf %104, %92 : vector<48x1xf32>
    %106 = arith.divf %105, %104 : vector<48x1xf32>
    %107 = arith.subf %93, %106 : vector<48x1xf32>
    %cst_26 = arith.constant 0.000000e+00 : f32
    %108 = vector.broadcast %cst_26 : f32 to vector<48x1xf32>
    %109 = arith.cmpf ogt, %65, %108 : vector<48x1xf32>
    %cst_27 = arith.constant 1.000000e+00 : f32
    %110 = vector.broadcast %cst_27 : f32 to vector<48x1xf32>
    %111 = arith.subf %110, %107 : vector<48x1xf32>
    %cst_28 = arith.constant 0.000000e+00 : f32
    %112 = vector.broadcast %cst_28 : f32 to vector<48x1xf32>
    %113 = arith.select %109, %111, %112 : vector<48x1xi1>, vector<48x1xf32>
    %114 = vector.shape_cast %113 : vector<48x1xf32> to vector<1x48x1xf32>
    %cst_29 = arith.constant dense<0.000000e+00> : vector<1xf32>
    %115 = vector.multi_reduction <add>, %114, %cst_29 [1, 2] : vector<1x48x1xf32> to vector<1xf32>
    %116 = vector.shape_cast %115 : vector<1xf32> to vector<1x1x1xf32>
    %117 = vector.extract %116[0, 0, 0] : f32 from vector<1x1x1xf32>
    %cst_30 = arith.constant 1.000000e+00 : f32
    %118 = arith.maximumf %cst_30, %22 : f32
    %119 = arith.divf %62, %118 : f32
    %c0_31 = arith.constant 0 : index
    %120 = memref.load %arg5[%c0_31] : memref<2xf32, #tpu.memory_space<smem>>
    memref.store %119, %arg5[%c0_31] : memref<2xf32, #tpu.memory_space<smem>>
    %121 = arith.divf %117, %118 : f32
    %c1 = arith.constant 1 : index
    %122 = memref.load %arg5[%c1] : memref<2xf32, #tpu.memory_space<smem>>
    memref.store %121, %arg5[%c1] : memref<2xf32, #tpu.memory_space<smem>>
    return
  }
}

</mosaic_0001>

<bundles_post_ra>
// kernel: tile.9
= control target key start
LH: loop header
LB: loop body
LE: loop exit
PB: predicated region body
PF: predicated region fallthrough
CT: control target
= control target key end

     0   :  { %s69_s10 = smov 21   ;;  %s70_s11 = smov 15   ;;  %vm3_vm0 = vcmask 23552   ;;  %vm9_vm1 = vcmask 195752   ;;  %vm15_vm2 = vcmask 171152   ;;  %vm21_vm3 = vcmask 146552   ;;  %s113_s0 = inlined_call_operand.vmem [shape: s32[8,3], index: 0, kind: input, shape index: {}]   ;;  %s114_s1 = inlined_call_operand.vmem [shape: s32[24], index: 1, kind: output, shape index: {}]  }
   0x1   :  { %v55_v0 = vld [vmem:[%s113_s0 + $0x7] sm:$0x1]   ;;  %v57_v1 = vld [vmem:[%s113_s0 + $0x5] sm:$0x1]   ;;  %v56_v2 = vld [vmem:[%s113_s0 + $0x6] sm:$0x1]  }
   0x2   :  { %7 = vrot.lane.b32.xlu0 %v55_v0, %s69_s10  ;;  %19 = vrot.lane.b32.xlu1 %v57_v1, %s70_s11  ;;  %v58_v3 = vld [vmem:[%s113_s0 + $0x4] sm:$0x1]   ;;  %v2_v4 = vld [vmem:[%s113_s0] sm:$0x1]   ;;  %s71_s18 = smov 18   ;;  %s72_s19 = smov 12  }
   0x3   :  { %4 = vst.msk [vmem:[#allocation0] sm:$0x1] %vm3_vm0, %v2_v4   ;;  %v59_v5 = vld [vmem:[%s113_s0 + $0x3] sm:$0x1]   ;;  %v60_v6 = vld [vmem:[%s113_s0 + $0x2] sm:$0x1]  }
   0x4   :  { %s73_s24 = smov 9   ;;  %s74_s25 = smov 6   ;;  %v61_v7 = vld [vmem:[%s113_s0 + $0x1] sm:$0x1]   ;;  %vm27_vm4 = vcmask 121952   ;;  %vm33_vm5 = vcmask 97352  }
   0x5   :  { %s75_s0 = smov 3   ;;  %vm39_vm6 = vcmask 72752   ;;  %vm45_vm7 = vcmask 48152  }
   0x6   :  { %13 = vrot.lane.b32.xlu0 %v56_v2, %s71_s18  ;;  %25 = vrot.lane.b32.xlu1 %v58_v3, %s72_s19 }
   0xa   :  { %31 = vrot.lane.b32.xlu0 %v59_v5, %s73_s24  ;;  %37 = vrot.lane.b32.xlu1 %v60_v6, %s74_s25 }
   0xe   :  { %43 = vrot.lane.b32.xlu0 %v61_v7, %s75_s0 }
  0x74   :  { %v8_v8 = vpop.permute.xlu0 %7   ;;  %v20_v9 = vpop.permute.xlu1 %19  }
  0x75   :  { %10 = vst.msk [vmem:[#allocation0] sm:$0x1] %vm9_vm1, %v8_v8  }
  0x78   :  { %v14_v10 = vpop.permute.xlu0 %13   ;;  %v26_v11 = vpop.permute.xlu1 %25  }
  0x79   :  { %16 = vst.msk [vmem:[#allocation0] sm:$0x1] %vm15_vm2, %v14_v10  }
  0x7a   :  { %22 = vst.msk [vmem:[#allocation0] sm:$0x1] %vm21_vm3, %v20_v9  }
  0x7b   :  { %28 = vst.msk [vmem:[#allocation0] sm:$0x1] %vm27_vm4, %v26_v11  }
  0x7c   :  { %v32_v12 = vpop.permute.xlu0 %31   ;;  %v38_v13 = vpop.permute.xlu1 %37  }
  0x7d   :  { %34 = vst.msk [vmem:[#allocation0] sm:$0x1] %vm33_vm5, %v32_v12  }
  0x7e   :  { %40 = vst.msk [vmem:[#allocation0] sm:$0x1] %vm39_vm6, %v38_v13  }
  0x80   :  { %v44_v14 = vpop.permute.xlu0 %43  }
  0x81   :  { %46 = vst.msk [vmem:[#allocation0] sm:$0x1] %vm45_vm7, %v44_v14  }
  0x88   :  { %v51_v15 = vld [vmem:[#allocation0] sm:$0x1] }
  0x89   :  { %54 = vst [vmem:[%s114_s1] sm:$0x1] %v51_v15 }

// kernel: forward_losses.3
= control target key start
LH: loop header
LB: loop body
LE: loop exit
PB: predicated region body
PF: predicated region fallthrough
CT: control target
= control target key end

     0   :  { %vm38_vm0 = vcmask 64512   ;;  %vm151_vm1 = vcmask 261120   ;;  %vm361_vm2 = vcmask 97280   ;;  %s550_s1 = inlined_call_operand.vmem [shape: f32[8,32], index: 1, kind: input, shape index: {}]   ;;  %s551_s0 = inlined_call_operand.vmem [shape: f32[32,8], index: 0, kind: input, shape index: {}]   ;;  %s552_s3 = inlined_call_operand.vmem [shape: f32[32,32], index: 3, kind: input, shape index: {}]   ;;  %s553_s5 = inlined_call_operand.vmem [shape: f32[32,12], index: 5, kind: input, shape index: {}]   ;;  %s554_s2 = inlined_call_operand.vmem [shape: f32[1,32], index: 2, kind: input, shape index: {}]   ;;  %s555_s4 = inlined_call_operand.vmem [shape: f32[1,32], index: 4, kind: input, shape index: {}]   ;;  %s556_s6 = inlined_call_operand.vmem [shape: f32[1,12], index: 6, kind: input, shape index: {}]   ;;  %s557_s7 = inlined_call_operand.vmem [shape: f32[32,12], index: 7, kind: output, shape index: {}]  }
   0x1   :  { %v30_v0 = vld [vmem:[%s550_s1] sm:$0xff]  ;;  %v27_v2 = vld [vmem:[%s551_s0 + $0x8] sm:$0xff]  ;;  %v28_v3 = vld [vmem:[%s551_s0 + $0x10] sm:$0xff] }
   0x2   :  { %v26_v1 = vld [vmem:[%s551_s0] sm:$0xff]  ;;  %406 = vmatprep.subr.mxu0 %v30_v0  ;;  %v29_v4 = vld [vmem:[%s551_s0 + $0x18] sm:$0xff]  ;;  %v142_v6 = vld [vmem:[%s552_s3 + $0x10] sm:$0xff] }
   0x3   :  { %408 = vmatprep.mubr.msk.f32.mxu0 %vm38_vm0, %v26_v1  ;;  %407 = vmatpush3.msra.mxu0 %v30_v0  ;;  %v143_v5 = vld [vmem:[%s552_s3 + $0x18] sm:$0xff]  ;;  %v141_v7 = vld [vmem:[%s552_s3 + $0x8] sm:$0xff]  ;;  %v140_v8 = vld [vmem:[%s552_s3] sm:$0xff] }
   0x4   :  { %409 = vmatmul.mubr.msk.f32.vlgmr.msra.gmra.mxu0 %vm38_vm0, %v27_v2  ;;  %414 = vmatprep.subr.mxu1 %v143_v5  ;;  %v256_v9 = vld [vmem:[%s553_s5 + $0x18] sm:$0xff]  ;;  %v370_v10 = vld [vmem:[%s554_s2] ss:$0 sm:$0xff]  ;;  %v255_v23 = vld [vmem:[%s553_s5 + $0x10] sm:$0xff] }
   0x5   :  { %411 = vmatprep.mubr.msk.f32.mxu0 %vm38_vm0, %v28_v3  ;;  %415 = vmatpush3.msra.mxu1 %v143_v5  ;;  %v254_v24 = vld [vmem:[%s553_s5 + $0x8] sm:$0xff]  ;;  %v253_v25 = vld [vmem:[%s553_s5] sm:$0xff] }
   0x6   :  { %416 = vmatprep.subr.mxu1 %v142_v6  ;;  %428 = vmatprep.subr.mxu0 %v256_v9  ;;  %v375_v26 = vld [vmem:[%s555_s4] ss:$0 sm:$0xff] }
   0x7   :  { %417 = vmatpush3.msra.mxu1 %v142_v6  ;;  %429 = vmatpush3.msra.mxu0 %v256_v9  ;;  %v380_v39 = vld [vmem:[%s556_s6] ss:$0 sm:$0xff] }
   0x8   :  { %412 = vmatmul.mubr.msk.f32.gmra.mxu0 %vm38_vm0, %v29_v4  ;;  %418 = vmatprep.subr.mxu1 %v141_v7 }
   0x9   :  { %419 = vmatpush3.msra.mxu1 %v141_v7  ;;  %430 = vmatprep.subr.mxu0 %v255_v23 }
   0xa   :  { %420 = vmatprep.subr.mxu1 %v140_v8  ;;  %431 = vmatpush3.msra.mxu0 %v255_v23 }
   0xb   :  { %421 = vmatpush3.msra.mxu1 %v140_v8  ;;  %432 = vmatprep.subr.mxu0 %v254_v24 }
   0xc   :  { %433 = vmatpush3.msra.mxu0 %v254_v24 }
   0xd   :  { %434 = vmatprep.subr.mxu0 %v253_v25 }
   0xe   :  { %435 = vmatpush3.msra.mxu0 %v253_v25 }
  0xc4   :  { %v410_v11 = vpop.f32.mrf.mxu0 }
  0xc5   :  { %v123_v12 = vadd.f32 %v410_v11, %v370_v10 }
  0xc6   :  { %v117_v13 = vpop.f32.mrf.mxu0 }
  0xc7   :  { %v118_v14 = vadd.f32 %v370_v10, %v117_v13  ;;  %v137_v17 = vmax.f32 %v123_v12, 0.0 }
  0xc8   :  { %v413_v15 = vpop.f32.mrf.mxu0 }
  0xc9   :  { %v136_v16 = vmax.f32 %v118_v14, 0.0  ;;  %v133_v18 = vadd.f32 %v413_v15, %v370_v10 }
  0xca   :  { %v127_v19 = vpop.f32.mrf.mxu0 }
  0xcb   :  { %v128_v20 = vadd.f32 %v370_v10, %v127_v19  ;;  %422 = vmatprep.mubr.msk.f32.mxu1 %vm151_vm1, %v136_v16  ;;  %v139_v22 = vmax.f32 %v133_v18, 0.0 }
  0xcc   :  { %423 = vmatmul.mubr.msk.f32.vlgmr.msra.gmra.mxu1 %vm151_vm1, %v137_v17 }
  0xcd   :  { %v138_v21 = vmax.f32 %v128_v20, 0.0 }
  0xcf   :  { %425 = vmatprep.mubr.msk.f32.mxu1 %vm151_vm1, %v138_v21 }
  0xd0   :  { %426 = vmatmul.mubr.msk.f32.gmra.mxu1 %vm151_vm1, %v139_v22 }
 0x18c   :  { %v424_v27 = vpop.f32.mrf.mxu1 }
 0x18d   :  { %v236_v28 = vadd.f32 %v424_v27, %v375_v26 }
 0x18e   :  { %v230_v29 = vpop.f32.mrf.mxu1 }
 0x18f   :  { %v231_v30 = vadd.f32 %v375_v26, %v230_v29  ;;  %v250_v33 = vmax.f32 %v236_v28, 0.0 }
 0x190   :  { %v427_v31 = vpop.f32.mrf.mxu1 }
 0x191   :  { %v249_v32 = vmax.f32 %v231_v30, 0.0  ;;  %v246_v34 = vadd.f32 %v427_v31, %v375_v26 }
 0x192   :  { %v240_v35 = vpop.f32.mrf.mxu1 }
 0x193   :  { %v241_v36 = vadd.f32 %v375_v26, %v240_v35  ;;  %436 = vmatprep.mubr.msk.f32.mxu0 %vm151_vm1, %v249_v32  ;;  %v252_v38 = vmax.f32 %v246_v34, 0.0 }
 0x194   :  { %437 = vmatmul.mubr.msk.f32.vlgmr.msra.gmra.mxu0 %vm151_vm1, %v250_v33 }
 0x195   :  { %v251_v37 = vmax.f32 %v241_v36, 0.0 }
 0x197   :  { %439 = vmatprep.mubr.msk.f32.mxu0 %vm151_vm1, %v251_v37 }
 0x198   :  { %440 = vmatmul.mubr.msk.f32.gmra.mxu0 %vm151_vm1, %v252_v38 }
 0x254   :  { %v438_v40 = vpop.f32.mrf.mxu0 }
 0x255   :  { %v348_v41 = vadd.f32 %v438_v40, %v380_v39 }
 0x256   :  { %v342_v42 = vpop.f32.mrf.mxu0 }
 0x257   :  { %363 = vst.msk [vmem:[%s557_s7 + $0x8] sm:$0xff] %vm361_vm2, %v348_v41  ;;  %v343_v43 = vadd.f32 %v380_v39, %v342_v42 }
 0x258   :  { %v441_v44 = vpop.f32.mrf.mxu0 }
 0x259   :  { %362 = vst.msk [vmem:[%s557_s7] sm:$0xff] %vm361_vm2, %v343_v43  ;;  %v358_v45 = vadd.f32 %v441_v44, %v380_v39 }
 0x25a   :  { %v352_v46 = vpop.f32.mrf.mxu0 }
 0x25b   :  { %365 = vst.msk [vmem:[%s557_s7 + $0x18] sm:$0xff] %vm361_vm2, %v358_v45  ;;  %v353_v47 = vadd.f32 %v380_v39, %v352_v46 }
 0x25d   :  { %364 = vst.msk [vmem:[%s557_s7 + $0x10] sm:$0xff] %vm361_vm2, %v353_v47 }

// kernel: forward_losses.4
= control target key start
LH: loop header
LB: loop body
LE: loop exit
PB: predicated region body
PF: predicated region fallthrough
CT: control target
= control target key end

     0   :  { %s1123_s12 = smov 0   ;;  %s1713_s0 = inlined_call_operand.vmem [shape: f32[2,32,2], index: 0, kind: input, shape index: {}]   ;;  %s1714_s1 = inlined_call_operand.vmem [shape: f32[32,4], index: 1, kind: input, shape index: {}]   ;;  %s1715_s2 = inlined_call_operand.vmem [shape: f32[2,4,3], index: 2, kind: input, shape index: {}]   ;;  %s1716_s3 = inlined_call_operand.vmem [shape: f32[2,32,14], index: 3, kind: output, shape index: {}]  }
   0x1 LB: > { %s1000_s13 = sadd.s32 4294967295, %s1091_s12   ;;  %p1004_p0 = scmp.ge.s32.totalorder %s1091_s12, 1  ;;  %s1091_s12 = sphi %s1123_s12, %s13_s12  }
   0x2   : > { %p146_p1 = scmp.lt.s32.totalorder %s1091_s12, 3 }
   0x4   : > { %p147_p2 = pnand %p1004_p0, %p146_p1 }
   0x6   : > { %150 = sbr.rel (%p147_p2) target bundleno = 795 (0x31b), region = 32 }
   0xb   : > { %v1134_v0 = vld [vmem:[%s1714_s1] sm:$0xff]  ;;  %v1139_v1 = vld [vmem:[%s1714_s1 + $0x10] sm:$0xff]  ;;  %s1093_s18 = smov 2   ;;  %v1148_v2 = vld [vmem:[%s1714_s1 + $0x8] sm:$0xff]  ;;  %v1717_v4 = vmov 2   ;;  %s1095_s23 = smov 126   ;;  %v408_v61 = vlaneseq }
   0xc   : > { %201 = vrot.lane.b32.xlu0 %v1134_v0, %s1093_s18  ;;  %205 = vrot.lane.b32.xlu1 %v1139_v1, %s1093_s18  ;;  %1731 = vst [vmem:[#allocation2_spill] sm:$0xff] %v1148_v2  ;;  %v1153_v3 = vld [vmem:[%s1714_s1 + $0x18] sm:$0xff]  ;;  %s1096_s24 = smov 127   ;;  %v1719_v13 = vmov 0   ;;  %v1098_v14 = vmov 3   ;;  %v1721_v18 = vmov 1  }
   0xd   : > { %1036 = vset.pattern.permute.xlu1 %v1717_v4  ;;  %1037 = vset.pattern.permute.xlu0 %v1717_v4  ;;  %p174_p3 = scmp.lt.s32.totalorder %s1000_s13, 1  ;;  %s1100_s6 = smov 7   ;;  %vm345_vm0 = vcmask 7168   ;;  %vm350_vm1 = vcmask 15360   ;;  %vm355_vm2 = vcmask 23552   ;;  %vm908_vm3 = vcmask 31744  }
   0xe   : > { %s1101_s7 = smov 4   ;;  %s1102_s8 = smov 10   ;;  %vm913_vm4 = vcmask 56320   ;;  %vm918_vm5 = vcmask 80896   ;;  %vm923_vm6 = vcmask 105472   ;;  %vm928_vm7 = vcmask 113664  }
   0xf   : > { %s1751_s13 = smov (!%p174_p3, %s1000_s13), 1 }
  0x10   : > { %203 = vrot.lane.b32.xlu0 %v1148_v2, %s1093_s18  ;;  %207 = vrot.lane.b32.xlu1 %v1153_v3, %s1093_s18  ;;  %s1016_s25 = sshll.u32 %s1751_s13, 5  ;;  %s1007_s29 = sshll.u32 %s1751_s13, 2 }
  0x11   : > { %s1244_s28 = scalar_lea.vmem %s1713_s0, %s1016_s25  ;;  %s182_s5 = scalar_lea.vmem %s1715_s2, %s1007_s29 }
  0x12   : > { %v1247_v32 = vld [vmem:[%s1244_s28] sm:$0xff]  ;;  %v1251_v34 = vld [vmem:[%s1244_s28 + $0x8] sm:$0xff]  ;;  %v1254_v35 = vld [vmem:[%s1244_s28 + $0x10] sm:$0xff]  ;;  %s1672_s15 = scalar_lea.vmem %s1716_s3, %s1016_s25 }
  0x13   : > { %v273_v33 = vmin.f32 %v1247_v32, 4.1351666  ;;  %v274_v36 = vmin.f32 %v1251_v34, 4.1351666  ;;  %v275_v38 = vmin.f32 %v1254_v35, 4.1351666 }
  0x14   : > { %370 = vrot.lane.b32.xlu1 %v1148_v2, %s1095_s23  ;;  %368 = vrot.lane.b32.xlu0 %v1134_v0, %s1095_s23  ;;  %v191_v59 = vld [vmem:[%s1244_s28 + $0x18] sm:$0xff] }
  0x15   : > { %v277_v37 = vmul.f32 1.442695, %v273_v33  ;;  %v279_v39 = vmul.f32 1.442695, %v274_v36  ;;  %v281_v40 = vmul.f32 1.442695, %v275_v38 }
  0x16   : > { %v276_v60 = vmin.f32 %v191_v59, 4.1351666 }
  0x17   : > { %1058 = vpow2.f32 %v277_v37 }
  0x18   : > { %374 = vrot.lane.b32.xlu1 %v1153_v3, %s1095_s23  ;;  %372 = vrot.lane.b32.xlu0 %v1139_v1, %s1095_s23  ;;  %1060 = vpow2.f32 %v279_v39  ;;  %v283_v62 = vmul.f32 1.442695, %v276_v60 }
  0x19   : > { %1062 = vpow2.f32 %v281_v40 }
  0x1a   : > { %1064 = vpow2.f32 %v283_v62 }
  0x1c   : > { %597 = vperm.xlu1 %1036, %v1134_v0  }
  0x24   : > { %v1059_v45 = vpop.eup %1058 }
  0x25   : > { %v1061_v48 = vpop.eup %1060 }
  0x26   : > { %v1063_v50 = vpop.eup %1062 }
  0x7e   : > { %v202_v5 = vpop.permute.xlu0 %201  ;;  %v206_v6 = vpop.permute.xlu1 %205 }
  0x7f   : > { %v1171_v7 = vsub.f32 %v1134_v0, %v202_v5  ;;  %v1176_v8 = vsub.f32 %v1139_v1, %v206_v6  ;;  %v1294_v6 = vshrl.u32 %v408_v61, 7 }
  0x81   : > { %245 = vrot.lane.b32.xlu0 %v1171_v7, %s1095_s23  ;;  %v217_v16 = vmul.f32 0.5, %v1171_v7  ;;  %v219_v19 = vmul.f32 0.5, %v1176_v8 }
  0x82   : > { %v204_v9 = vpop.permute.xlu0 %203  ;;  %v208_v10 = vpop.permute.xlu1 %207 }
  0x83   : > { %v1179_v11 = vsub.f32 %v1148_v2, %v204_v9  ;;  %v1186_v12 = vsub.f32 %v1153_v3, %v208_v10  ;;  %v1723_v9 = vsub.s32 3, %v1294_v6 }
  0x85   : > { %249 = vrot.lane.b32.xlu0 %v1176_v8, %s1095_s23  ;;  %247 = vrot.lane.b32.xlu1 %v1179_v11, %s1095_s23  ;;  %v218_v22 = vmul.f32 0.5, %v1179_v11  ;;  %v220_v25 = vmul.f32 0.5, %v1186_v12 }
  0x86   : > { %v371_v15 = vpop.permute.xlu1 %370  ;;  %v369_v20 = vpop.permute.xlu0 %368 }
  0x87   : > { %v381_v17 = vadd.f32 %v371_v15, %v1148_v2  ;;  %v380_v23 = vadd.f32 %v369_v20, %v1134_v0 }
  0x89   : > { %285 = vrot.lane.b32.xlu0 %v1171_v7, %s1096_s24  ;;  %251 = vrot.lane.b32.xlu1 %v1186_v12, %s1095_s23  ;;  %v385_v21 = vmul.f32 0.5, %v381_v17  ;;  %v384_v26 = vmul.f32 0.5, %v380_v23 }
  0x8a   : > { %v373_v24 = vpop.permute.xlu0 %372  ;;  %v375_v28 = vpop.permute.xlu1 %374 }
  0x8b   : > { %v382_v27 = vadd.f32 %v373_v24, %v1139_v1  ;;  %v383_v30 = vadd.f32 %v375_v28, %v1153_v3 }
  0x8d   : > { %289 = vrot.lane.b32.xlu0 %v1176_v8, %s1096_s24  ;;  %287 = vrot.lane.b32.xlu1 %v1179_v11, %s1096_s24  ;;  %v386_v29 = vmul.f32 0.5, %v382_v27  ;;  %v387_v31 = vmul.f32 0.5, %v383_v30 }
  0x91   : > { %601 = vperm.xlu0 %1037, %v1148_v2   ;;  %605 = vperm.xlu1 %1036, %v1139_v1  }
  0x95   : > { %609 = vperm.xlu0 %1037, %v1153_v3   ;;  %1038 = vset.pattern.permute.xlu1 %v1719_v13 }
  0x96   : > { %621 = vperm.xlu1 %1038, %v1134_v0  }
  0x97   : > { %v1258_v41 = vpop.permute.xlu1 %597 }
  0x99   : > { %1040 = vset.pattern.permute.xlu0 %v1098_v14 }
  0x9a   : > { %661 = vperm.xlu0 %1040, %v1139_v1   ;;  %1039 = vset.pattern.permute.xlu1 %v1098_v14 }
  0x9b   : > { %653 = vperm.xlu1 %1039, %v1134_v0  }
  0x9e   : > { %493 = vperm.xlu0 %1040, %v1171_v7  }
  0x9f   : > { %657 = vperm.xlu1 %1039, %v1148_v2  }
  0xa2   : > { %505 = vperm.xlu0 %1040, %v1186_v12  }
  0xa3   : > { %291 = vrot.lane.b32.xlu1 %v1186_v12, %s1096_s24 }
  0xa6   : > { %1041 = vset.pattern.permute.xlu0 %v1717_v4 }
  0xa7   : > { %557 = vperm.xlu0 %1041, %v1171_v7   ;;  %497 = vperm.xlu1 %1039, %v1179_v11  }
  0xab   : > { %569 = vperm.xlu0 %1041, %v1186_v12   ;;  %501 = vperm.xlu1 %1039, %v1176_v8  }
  0xaf   : > { %225 = vrot.lane.b32.xlu0 %v217_v16, %s1095_s23  ;;  %1042 = vset.pattern.permute.xlu1 %v1717_v4  ;;  %v1305_v16 = vld [vmem:[%s182_s5] sm:$0xf] }
  0xb0   : > { %561 = vperm.xlu1 %1042, %v1179_v11   ;;  %1044 = vset.pattern.permute.xlu0 %v1721_v18  ;;  %v1310_v17 = vrot.slane %v1305_v16, %v1723_v9  ;;  %v361_v20 = vrot.slane %v1305_v16, 2 }
  0xb3   : > { %229 = vrot.lane.b32.xlu0 %v219_v19, %s1095_s23 }
  0xb4   : > { %565 = vperm.xlu1 %1042, %v1176_v8  }
  0xb7   : > { %427 = vperm.xlu0 %1044, %v385_v21  }
  0xb8   : > { %227 = vrot.lane.b32.xlu1 %v218_v22, %s1095_s23  ;;  %v365_v22 = vrot.slane %v1305_v16, 6 }
  0xb9   : > { %1043 = vset.pattern.permute.xlu1 %v1721_v18 }
  0xbc   : > { %231 = vrot.lane.b32.xlu1 %v220_v25, %s1095_s23 }
  0xc0   : > { %422 = vperm.xlu1 %1043, %v384_v26   ;;  %v1065_v26 = vpop.eup %1064 }
  0xc4   : > { %432 = vperm.xlu1 %1043, %v386_v29  }
  0xc8   : > { %437 = vperm.xlu1 %1043, %v387_v31  }
  0xf3   : > { %v1260_v42 = vpop.permute.xlu0 %245 }
  0xf7   : > { %v1262_v43 = vpop.permute.xlu1 %247  ;;  %v1264_v44 = vpop.permute.xlu0 %249 }
  0xfb   : > { %v1266_v46 = vpop.permute.xlu1 %251  ;;  %v1268_v47 = vpop.permute.xlu0 %285 }
  0xfc   : > { %v297_v49 = vmul.f32 %v1059_v45, %v1268_v47 }
  0xfe   : > { %v301_v51 = vmul.f32 0.5, %v297_v49  ;;  %v1272_v52 = vmul.f32 %v297_v49, %v1260_v42 }
  0xff   : > { %v1274_v53 = vpop.permute.xlu1 %287  ;;  %v1276_v54 = vpop.permute.xlu0 %289 }
 0x100   : > { %v1279_v55 = vmul.f32 %v1061_v48, %v1274_v53  ;;  %v299_v56 = vmul.f32 %v1063_v50, %v1276_v54  ;;  %309 = vrot.lane.b32.xlu0 %v301_v51, %s1096_s24  ;;  %v257_v48 = vmul.f32 %v1260_v42, %v1247_v32 }
 0x102   : > { %463 = vperm.xlu1 %1043, %v1279_v55   ;;  %v303_v57 = vmul.f32 0.5, %v299_v56  ;;  %v1285_v58 = vmul.f32 %v299_v56, %v1264_v44  ;;  %v302_v31 = vmul.f32 0.5, %v1279_v55  ;;  %v1010_v51 = vclamps-f32 %v257_v48, 32.0 }
 0x104   : > { %313 = vrot.lane.b32.xlu0 %v303_v57, %s1096_s24 }
 0x108   : > { %458 = vperm.xlu0 %1044, %v297_v49  }
 0x10c   : > { %v1290_v63 = vpop.permute.xlu1 %605  ;;  %468 = vperm.xlu0 %1044, %v299_v56   ;;  %v1292_v5 = vpop.permute.xlu0 %601  ;;  %v260_v56 = vmul.f32 %v1266_v46, %v191_v59  ;;  %v258_v59 = vmul.f32 %v1262_v43, %v1251_v34 }
 0x10d   : > { %1732 = vst [vmem:[#allocation3_spill] sm:$0xff] %v1290_v63 }
 0x10e   : > { %v1013_v62 = vclamps-f32 %v260_v56, 32.0 }
 0x110   : > { %681 = vperm.xlu0 %1044, %v1148_v2   ;;  %v1301_v10 = vpop.permute.xlu0 %609 }
 0x111   : > { %1733 = vst [vmem:[#allocation4_spill] sm:$0xff] %v1301_v10  ;;  %v1303_v15 = vpop.permute.xlu1 %621 }
 0x114   : > { %1047 = vset.pattern.permute.xlu0 %v1719_v13 }
 0x115   : > { %v1313_v19 = vpop.permute.xlu0 %661  ;;  %625 = vperm.xlu0 %1047, %v1148_v2  }
 0x116   : > { %v1318_v21 = vpop.permute.xlu1 %653 }
 0x119   : > { %v1322_v23 = vpop.permute.xlu0 %493 }
 0x11a   : > { %v1324_v24 = vpop.permute.xlu1 %657 }
 0x11b   : > { %v673_v25 = vmin.f32 %v1324_v24, %v1310_v17 }
 0x11d   : > { %v1330_v28 = vpop.permute.xlu0 %505 }
 0x11e   : > { %v1328_v27 = vpop.permute.xlu1 %291 }
 0x11f   : > { %v1333_v29 = vmul.f32 %v1065_v26, %v1328_v27  ;;  %v1011_v26 = vclamps-f32 %v258_v59, 32.0 }
 0x121   : > { %473 = vperm.xlu1 %1043, %v1333_v29   ;;  %v304_v40 = vmul.f32 0.5, %v1333_v29 }
 0x122   : > { %v1336_v30 = vpop.permute.xlu1 %497  ;;  %v1339_v33 = vpop.permute.xlu0 %557 }
 0x125   : > { %311 = vrot.lane.b32.xlu1 %v302_v31, %s1096_s24  ;;  %v259_v31 = vmul.f32 %v1264_v44, %v1254_v35 }
 0x126   : > { %v1342_v36 = vpop.permute.xlu1 %501  ;;  %1045 = vset.pattern.permute.xlu1 %v1098_v14  ;;  %v1346_v37 = vpop.permute.xlu0 %569 }
 0x129   : > { %665 = vperm.xlu1 %1045, %v1153_v3  }
 0x12a   : > { %v226_v45 = vpop.permute.xlu0 %225 }
 0x12b   : > { %v1348_v38 = vpop.permute.xlu1 %561  ;;  %v237_v49 = vadd.f32 %v226_v45, %v1134_v0  ;;  %v1012_v45 = vclamps-f32 %v259_v31, 32.0 }
 0x12d   : > { %1046 = vset.pattern.permute.xlu1 %v1721_v18  ;;  %v269_v60 = vadd.f32 %v1010_v51, %v237_v49 }
 0x12e   : > { %677 = vperm.xlu1 %1046, %v1134_v0   ;;  %v230_v42 = vpop.permute.xlu0 %229 }
 0x12f   : > { %v1352_v39 = vpop.permute.xlu1 %565  ;;  %v239_v0 = vadd.f32 %v230_v42, %v1139_v1  ;;  %v410_v42 = vsub.s32 0, %v1294_v6 }
 0x131   : > { %v271_v48 = vadd.f32 %v1012_v45, %v239_v0 }
 0x132   : > { %315 = vrot.lane.b32.xlu1 %v304_v40, %s1096_s24 }
 0x133   : > { %v228_v14 = vpop.permute.xlu1 %227 }
 0x134   : > { %v238_v50 = vadd.f32 %v228_v14, %v1148_v2  ;;  %v1379_v14 = vpop.permute.xlu0 %427 }
 0x136   : > { %685 = vperm.xlu1 %1046, %v1139_v1   ;;  %531 = vperm.xlu0 %1047, %v238_v50   ;;  %v1375_v40 = vadd.f32 %v1011_v26, %v238_v50  ;;  %v442_v50 = vsub.s32 1, %v1294_v6 }
 0x137   : > { %v232_v57 = vpop.permute.xlu1 %231 }
 0x138   : > { %v240_v61 = vadd.f32 %v232_v57, %v1153_v3 }
 0x13a   : > { %689 = vperm.xlu1 %1046, %v1153_v3   ;;  %390 = vperm.xlu0 %1047, %v269_v60   ;;  %v1364_v32 = vadd.f32 %v1013_v62, %v240_v61  ;;  %v1401_v62 = vsub.s32 2, %v1294_v6 }
 0x13c   : > { %v1414_v45 = vrot.slane %v1305_v16, %v1401_v62 }
 0x13e   : > { %1048 = vset.pattern.permute.xlu1 %v1719_v13  ;;  %405 = vperm.xlu0 %1047, %v1364_v32  }
 0x13f   : > { %526 = vperm.xlu1 %1048, %v237_v49  }
 0x143   : > { %536 = vperm.xlu1 %1048, %v239_v0  }
 0x147   : > { %541 = vperm.xlu1 %1048, %v240_v61   ;;  %v1395_v61 = vpop.permute.xlu1 %422 }
 0x14b   : > { %1049 = vset.pattern.permute.xlu1 %v1721_v18  ;;  %v1405_v26 = vpop.permute.xlu1 %432 }
 0x14c   : > { %814 = vperm.xlu1 %1049, %v1272_v52  }
 0x14f   : > { %v1422_v4 = vpop.permute.xlu1 %437 }
 0x150   : > { %1050 = vset.pattern.permute.xlu1 %v1719_v13 }
 0x151   : > { %395 = vperm.xlu1 %1050, %v1375_v40  }
 0x155   : > { %400 = vperm.xlu1 %1050, %v271_v48  }
 0x172   : > { %v310_v34 = vpop.permute.xlu0 %309 }
 0x173   : > { %v1381_v49 = vsub.f32 %v269_v60, %v310_v34  ;;  %v325_v51 = vadd.f32 %v310_v34, %v269_v60  ;;  %v1398_v60 = vrot.slane %v1305_v16, %v442_v50 }
 0x175   : > { %333 = vrot.lane.b32.xlu0 %v325_v51, %s1093_s18 }
 0x176   : > { %v314_v52 = vpop.permute.xlu0 %313 }
 0x177   : > { %v1384_v56 = vsub.f32 %v271_v48, %v314_v52  ;;  %v1386_v35 = vadd.f32 %v314_v52, %v271_v48  ;;  %v1417_v48 = vrot.slane %v1305_v16, %v410_v42 }
 0x179   : > { %337 = vrot.lane.b32.xlu0 %v1386_v35, %s1093_s18  ;;  %1735 = vst [vmem:[#allocation6_spill] sm:$0xff] %v1417_v48 }
 0x17d   : > { %757 = vperm.xlu0 %1047, %v325_v51   ;;  %v617_v51 = vmin.f32 %v1292_v5, %v1414_v45  ;;  %v1429_v13 = vpop.permute.xlu1 %463 }
 0x183   : > { %v1390_v44 = vpop.permute.xlu0 %458 }
 0x187   : > { %v1393_v57 = vpop.permute.xlu0 %468 }
 0x18b   : > { %v682_v0 = vpop.permute.xlu0 %681 }
 0x18c   : > { %v697_v59 = vmax.f32 %v682_v0, %v1398_v60 }
 0x18e   : > { %v1410_v31 = vsub.f32 %v673_v25, %v697_v59 }
 0x190   : > { %1734 = vst [vmem:[#allocation5_spill] sm:$0xff] %v1410_v31  ;;  %v626_v34 = vpop.permute.xlu0 %625  ;;  %v1724_v24 = vmax.f32 %v1410_v31, 0.0 }
 0x191   : > { %v641_v52 = vmax.f32 %v626_v34, %v1417_v48  ;;  %v363_v34 = vadd.f32 %v361_v20, %v1305_v16  ;;  %v1737_v20 = vmin.f32 %v1318_v21, %v1310_v17 }
 0x193   : > { %v645_v0 = vsub.f32 %v617_v51, %v641_v52 }
 0x195   : > { %v649_v25 = vmax.f32 %v645_v0, 0.0  ;;  %v640_v0 = vmax.f32 %v1303_v15, %v1417_v48 }
 0x197   : > { %v1427_v59 = vmul.f32 %v1724_v24, %v649_v25  ;;  %v616_v25 = vmin.f32 %v1258_v41, %v1414_v45  ;;  %v364_v24 = vmul.f32 0.5, %v363_v34 }
 0x199   : > { %1736 = vst [vmem:[#allocation7_spill] sm:$0xff] %v1427_v59  ;;  %v644_v10 = vsub.f32 %v616_v25, %v640_v0  ;;  %v1444_v63 = vrot.slane %v364_v24, %v442_v50  ;;  %v1454_v41 = vrot.slane %v364_v24, %v410_v42 }
 0x19b   : > { %v648_v48 = vmax.f32 %v644_v10, 0.0  ;;  %v445_v21 = vsub.f32 %v1379_v14, %v1444_v63  ;;  %v1738_v10 = vsub.s32 3, %v1294_v6  ;;  %v1739_v6 = vmin.f32 %v1313_v19, %v1310_v17 }
 0x19c   : > { %v1431_v18 = vpop.permute.xlu1 %473 }
 0x1a0   : > { %v312_v9 = vpop.permute.xlu1 %311 }
 0x1a1   : > { %v326_v5 = vadd.f32 %v312_v9, %v1375_v40 }
 0x1a3   : > { %335 = vrot.lane.b32.xlu1 %v326_v5, %s1093_s18 }
 0x1a4   : > { %v666_v51 = vpop.permute.xlu1 %665 }
 0x1a5   : > { %v675_v52 = vmin.f32 %v666_v51, %v1310_v17  ;;  %v1452_v51 = vsub.f32 %v1305_v16, %v365_v22  ;;  %v447_v17 = vsub.f32 %v1422_v4, %v1444_v63 }
 0x1a7   : > { %v1460_v50 = vrot.slane %v1452_v51, %v1401_v62  ;;  %v1472_v22 = vrot.slane %v1452_v51, %v1738_v10 }
 0x1a9   : > { %v678_v31 = vpop.permute.xlu1 %677  ;;  %v573_v24 = vsub.f32 %v1348_v38, %v1460_v50  ;;  %v572_v4 = vsub.f32 %v1339_v33, %v1460_v50  ;;  %v446_v33 = vsub.f32 %v1405_v26, %v1444_v63 }
 0x1aa   : > { %v696_v59 = vmax.f32 %v678_v31, %v1398_v60 }
 0x1ab   : > { %v450_v26 = vand.u32 2147483647, %v446_v33 }
 0x1ac   : > { %v1449_v2 = vsub.f32 %v1737_v20, %v696_v59  ;;  %v1477_v59 = vsub.f32 %v1375_v40, %v312_v9  ;;  %v1483_v20 = vand.u32 2147483647, %v445_v21  ;;  %v577_v40 = vand.u32 2147483647, %v573_v24 }
 0x1ad   : > { %v316_v15 = vpop.permute.xlu1 %315  ;;  %v483_v24 = vsub.f32 %v1431_v18, %v1460_v50  ;;  %v515_v18 = vsub.f32 %v1330_v28, %v1472_v22  ;;  %v574_v28 = vsub.f32 %v1352_v39, %v1460_v50  ;;  %v575_v39 = vsub.f32 %v1346_v37, %v1460_v50 }
 0x1ae   : > { %v704_v34 = vmax.f32 %v1449_v2, 0.0  ;;  %v328_v0 = vadd.f32 %v316_v15, %v1364_v32  ;;  %v1742_v37 = vmov 2   ;;  %v1747_v2 = vld [vmem:[#allocation4_spill] sm:$0xff] }
 0x1b0   : > { %339 = vrot.lane.b32.xlu1 %v328_v0, %s1093_s18  ;;  %769 = vperm.xlu0 %1047, %v328_v0   ;;  %v1467_v16 = vmul.f32 %v704_v34, %v648_v48  ;;  %v513_v48 = vsub.f32 %v1336_v30, %v1472_v22 }
 0x1b1   : > { %v686_v42 = vpop.permute.xlu1 %685  ;;  %v532_v31 = vpop.permute.xlu0 %531 }
 0x1b2   : > { %v698_v14 = vmax.f32 %v686_v42, %v1398_v60  ;;  %v545_v25 = vsub.f32 %v532_v31, %v1454_v41  ;;  %v1494_v42 = vsub.f32 %v1364_v32, %v316_v15  ;;  %v1498_v31 = vand.u32 2147483647, %v513_v48 }
 0x1b3   : > { %v444_v32 = vsub.f32 %v1395_v61, %v1444_v63  ;;  %v512_v61 = vsub.f32 %v1322_v23, %v1472_v22  ;;  %v451_v48 = vand.u32 2147483647, %v447_v17  ;;  %v576_v23 = vand.u32 2147483647, %v572_v4 }
 0x1b4   : > { %v1488_v0 = vsub.f32 %v1739_v6, %v698_v14  ;;  %v549_v10 = vand.u32 2147483647, %v545_v25  ;;  %761 = vperm.xlu1 %1050, %v326_v5   ;;  %783 = vperm.xlu0 %1047, %v1477_v59   ;;  %v514_v63 = vsub.f32 %v1342_v36, %v1472_v22  ;;  %v593_v36 = vmul.f32 %v1274_v53, %v1179_v11 }
 0x1b5   : > { %v690_v9 = vpop.permute.xlu1 %689  ;;  %v1491_v38 = vpop.permute.xlu0 %390  ;;  %v481_v53 = vsub.f32 %v1429_v13, %v1460_v50  ;;  %v594_v13 = vmul.f32 %v1276_v54, %v1176_v8 }
 0x1b6   : > { %v553_v30 = vadd.f32 %v549_v10, %v1483_v20  ;;  %v699_v21 = vmax.f32 %v690_v9, %v1398_v60  ;;  %v1740_v10 = vmov 1   ;;  %v1525_v9 = vand.u32 2147483647, %v444_v32 }
 0x1b7   : > { %v519_v32 = vand.u32 2147483647, %v515_v18  ;;  %v518_v22 = vand.u32 2147483647, %v514_v63 }
 0x1b8   : > { %v581_v19 = vadd.f32 %v577_v40, %v553_v30  ;;  %v1502_v5 = vsub.f32 %v675_v52, %v699_v21  ;;  %765 = vperm.xlu1 %1050, %v1386_v35   ;;  %793 = vperm.xlu0 %1047, %v1494_v42   ;;  %v753_v52 = vmul.f32 %v1279_v55, %v1262_v43  ;;  %v487_v43 = vand.u32 2147483647, %v483_v24 }
 0x1b9   : > { %v406_v15 = vpop.permute.xlu0 %405 }
 0x1ba   : > { %v415_v60 = vsub.f32 %v406_v15, %v1454_v41  ;;  %v527_v14 = vpop.permute.xlu1 %526  ;;  %v1512_v25 = vadd.f32 %v581_v19, %v1498_v31  ;;  %v1533_v19 = vand.u32 2147483647, %v512_v61 }
 0x1bb   : > { %v544_v35 = vsub.f32 %v527_v14, %v1454_v41  ;;  %v1741_v14 = vmov 0  }
 0x1bc   : > { %v419_v6 = vand.u32 2147483647, %v415_v60  ;;  %1051 = vset.pattern.permute.xlu0 %v1740_v10  ;;  %778 = vperm.xlu1 %1050, %v1381_v49  }
 0x1bd   : > { %v548_v40 = vand.u32 2147483647, %v544_v35  ;;  %819 = vperm.xlu0 %1051, %v753_v52   ;;  %v578_v52 = vand.u32 2147483647, %v574_v28 }
 0x1be   : > { %v455_v55 = vadd.f32 %v451_v48, %v419_v6  ;;  %v537_v30 = vpop.permute.xlu1 %536 }
 0x1bf   : > { %v552_v21 = vadd.f32 %v548_v40, %v1525_v9  ;;  %v546_v17 = vsub.f32 %v537_v30, %v1454_v41  ;;  %v755_v30 = vmul.f32 %v1333_v29, %v1266_v46  ;;  %v592_v29 = vmul.f32 %v1268_v47, %v1171_v7 }
 0x1c0   : > { %v491_v15 = vadd.f32 %v487_v43, %v455_v55  ;;  %788 = vperm.xlu1 %1050, %v1384_v56   ;;  %v579_v43 = vand.u32 2147483647, %v575_v39  ;;  %v595_v7 = vmul.f32 %v1328_v27, %v1186_v12 }
 0x1c1   : > { %v580_v24 = vadd.f32 %v576_v23, %v552_v21  ;;  %v550_v60 = vand.u32 2147483647, %v546_v17  ;;  %1053 = vset.pattern.permute.xlu0 %v1741_v14 }
 0x1c2   : > { %v1541_v4 = vadd.f32 %v519_v32, %v491_v15  ;;  %v542_v35 = vpop.permute.xlu1 %541  ;;  %629 = vperm.xlu0 %1053, %v1139_v1  }
 0x1c3   : > { %v554_v61 = vadd.f32 %v550_v60, %v450_v26  ;;  %v547_v18 = vsub.f32 %v542_v35, %v1454_v41  ;;  %v584_v6 = vadd.f32 %v580_v24, %v1533_v19  ;;  %v480_v24 = vsub.f32 %v1390_v44, %v1460_v50 }
 0x1c4   : > { %1052 = vset.pattern.permute.xlu1 %v1740_v10 }
 0x1c5   : > { %v582_v33 = vadd.f32 %v578_v52, %v554_v61  ;;  %v551_v40 = vand.u32 2147483647, %v547_v18  ;;  %824 = vperm.xlu1 %1052, %v1285_v58  }
 0x1c6   : > { %1056 = vset.pattern.permute.xlu0 %v1742_v37 }
 0x1c7   : > { %v555_v1 = vadd.f32 %v551_v40, %v451_v48  ;;  %v1551_v55 = vpop.permute.xlu1 %814  ;;  %719 = vperm.xlu0 %1056, %v593_v36   ;;  %v586_v23 = vadd.f32 %v582_v33, %v518_v22  ;;  %v485_v48 = vand.u32 2147483647, %v481_v53  ;;  %v1744_v40 = vld [vmem:[#allocation6_spill] sm:$0xff] }
 0x1c9   : > { %v583_v28 = vadd.f32 %v579_v43, %v555_v1  ;;  %829 = vperm.xlu1 %1052, %v755_v30   ;;  %v707_v1 = vmax.f32 %v1502_v5, 0.0 }
 0x1cb   : > { %v587_v21 = vadd.f32 %v583_v28, %v519_v32  ;;  %880 = vrot.lane.b32.xlu0 %v584_v6, %s1100_s6  ;;  %v412_v32 = vsub.f32 %v1491_v38, %v1454_v41  ;;  %v484_v38 = vand.u32 2147483647, %v480_v24  ;;  %v589_v6 = vrot.slane %v1452_v51, 1 }
 0x1cc   : > { %v396_v11 = vpop.permute.xlu1 %395  ;;  %1057 = vset.pattern.permute.xlu0 %v1740_v10 }
 0x1cd   : > { %v413_v58 = vsub.f32 %v396_v11, %v1454_v41  ;;  %1054 = vset.pattern.permute.xlu1 %v1741_v14  ;;  %v416_v47 = vand.u32 2147483647, %v412_v32 }
 0x1ce   : > { %633 = vperm.xlu1 %1054, %v1153_v3  }
 0x1cf   : > { %v417_v46 = vand.u32 2147483647, %v413_v58  ;;  %884 = vrot.lane.b32.xlu0 %v586_v23, %s1100_s6  ;;  %v452_v8 = vadd.f32 %v1525_v9, %v416_v47  ;;  %v1743_v9 = vld [vmem:[#allocation2_spill] sm:$0xff] }
 0x1d0   : > { %v401_v63 = vpop.permute.xlu1 %400 }
 0x1d1   : > { %v453_v17 = vadd.f32 %v1483_v20, %v417_v46  ;;  %v414_v20 = vsub.f32 %v401_v63, %v1454_v41  ;;  %v488_v60 = vadd.f32 %v484_v38, %v452_v8  ;;  %v706_v63 = vmax.f32 %v1488_v0, 0.0 }
 0x1d2   : > { %1055 = vset.pattern.permute.xlu1 %v1742_v37 }
 0x1d3   : > { %v489_v10 = vadd.f32 %v485_v48, %v453_v17  ;;  %714 = vperm.xlu1 %1055, %v592_v29   ;;  %v418_v54 = vand.u32 2147483647, %v414_v20  ;;  %v520_v27 = vadd.f32 %v1533_v19, %v488_v60  ;;  %v349_v19 = vsel %vm345_vm0, %v1494_v42, %v1153_v3 }
 0x1d4   : > { %v591_v3 = vmul.f32 %v589_v6, %v1452_v51  ;;  %v1745_v51 = vld [vmem:[#allocation3_spill] sm:$0xff] }
 0x1d5   : > { %v521_v15 = vadd.f32 %v1498_v31, %v489_v10  ;;  %v482_v31 = vsub.f32 %v1393_v57, %v1460_v50  ;;  %v454_v14 = vadd.f32 %v450_v26, %v418_v54  ;;  %v347_v57 = vsel %vm345_vm0, %v1477_v59, %v1743_v9  ;;  %v1746_v54 = vld [vmem:[#allocation7_spill] sm:$0xff] }
 0x1d6   : > { %v1609_v11 = vrot.slane %v591_v3, %v1401_v62  ;;  %v618_v17 = vmin.f32 %v1745_v51, %v1414_v45 }
 0x1d7   : > { %866 = vrot.lane.b32.xlu0 %v521_v15, %s1101_s7  ;;  %724 = vperm.xlu1 %1055, %v594_v13   ;;  %v486_v12 = vand.u32 2147483647, %v482_v31 }
 0x1d8   : > { %v832_v5 = vadd.f32 %v1551_v55, %v1609_v11 }
 0x1d9   : > { %v490_v41 = vadd.f32 %v486_v12, %v454_v14 }
 0x1db   : > { %729 = vperm.xlu1 %1055, %v595_v7   ;;  %v522_v44 = vadd.f32 %v518_v22, %v490_v41 }
 0x1df   : > { %882 = vrot.lane.b32.xlu1 %v1512_v25, %s1100_s6 }
 0x1e3   : > { %886 = vrot.lane.b32.xlu1 %v587_v21, %s1100_s6 }
 0x1e7   : > { %864 = vrot.lane.b32.xlu1 %v520_v27, %s1101_s7  ;;  %v1591_v26 = vpop.permute.xlu0 %333 }
 0x1eb   : > { %868 = vrot.lane.b32.xlu1 %v522_v44, %s1101_s7  ;;  %v1596_v35 = vpop.permute.xlu0 %337 }
 0x1ef   : > { %870 = vrot.lane.b32.xlu1 %v1541_v4, %s1101_s7 }
 0x1f8   : > { %v758_v52 = vpop.permute.xlu0 %757 }
 0x1f9   : > { %v772_v30 = vmin.f32 %v758_v52, %v1414_v45 }
 0x215   : > { %v336_v50 = vpop.permute.xlu1 %335 }
 0x216   : > { %v1589_v25 = vsel %vm350_vm1, %v347_v57, %v336_v50 }
 0x222   : > { %v340_v39 = vpop.permute.xlu1 %339 }
 0x223   : > { %v1599_v4 = vsel %vm350_vm1, %v349_v19, %v340_v39 }
 0x22b   : > { %v770_v61 = vpop.permute.xlu0 %769 }
 0x22c   : > { %v775_v33 = vmin.f32 %v770_v61, %v1414_v45 }
 0x22f   : > { %v762_v18 = vpop.permute.xlu1 %761  ;;  %v784_v59 = vpop.permute.xlu0 %783 }
 0x230   : > { %v773_v19 = vmin.f32 %v762_v18, %v1414_v45  ;;  %v797_v39 = vmax.f32 %v784_v59, %v1744_v40 }
 0x232   : > { %v801_v61 = vsub.f32 %v773_v19, %v797_v39 }
 0x233   : > { %v766_v36 = vpop.permute.xlu1 %765  ;;  %v794_v22 = vpop.permute.xlu0 %793 }
 0x234   : > { %v799_v37 = vmax.f32 %v794_v22, %v1744_v40  ;;  %v805_v6 = vmax.f32 %v801_v61, 0.0 }
 0x236   : > { %v803_v42 = vsub.f32 %v775_v33, %v799_v37  ;;  %v774_v37 = vmin.f32 %v766_v36, %v1414_v45 }
 0x237   : > { %v779_v43 = vpop.permute.xlu1 %778 }
 0x238   : > { %v807_v23 = vmax.f32 %v803_v42, 0.0  ;;  %v796_v28 = vmax.f32 %v779_v43, %v1744_v40  ;;  %v820_v21 = vpop.permute.xlu0 %819  ;;  %v1748_v42 = vld [vmem:[#allocation5_spill] sm:$0xff] }
 0x239   : > { %v833_v33 = vadd.f32 %v820_v21, %v1609_v11  ;;  %v1749_v43 = vmax.f32 %v1748_v42, 0.0 }
 0x23a   : > { %v800_v53 = vsub.f32 %v772_v30, %v796_v28  ;;  %v1611_v58 = vmul.f32 %v807_v23, %v707_v1 }
 0x23b   : > { %v789_v46 = vpop.permute.xlu1 %788 }
 0x23c   : > { %v804_v29 = vmax.f32 %v800_v53, 0.0  ;;  %v798_v22 = vmax.f32 %v789_v46, %v1744_v40 }
 0x23d   : > { %v630_v48 = vpop.permute.xlu0 %629 }
 0x23e   : > { %v642_v10 = vmax.f32 %v630_v48, %v1744_v40  ;;  %v808_v13 = vmul.f32 %v804_v29, %v704_v34  ;;  %v619_v34 = vmin.f32 %v1747_v2, %v1414_v45  ;;  %v802_v18 = vsub.f32 %v774_v37, %v798_v22  ;;  %v1083_v22 = vld [vmem:[%s1714_s1 + $0x18] sm:$0xff]  ;;  %v1084_v37 = vld [vmem:[%s1714_s1 + $0x10] sm:$0xff] }
 0x240   : > { %v646_v32 = vsub.f32 %v618_v17, %v642_v10  ;;  %v825_v62 = vpop.permute.xlu1 %824  ;;  %v836_v15 = vsub.f32 %v832_v5, %v808_v13  ;;  %v806_v23 = vmax.f32 %v802_v18, 0.0 }
 0x241   : > { %v834_v53 = vadd.f32 %v825_v62, %v1609_v11 }
 0x242   : > { %v650_v7 = vmax.f32 %v646_v32, 0.0  ;;  %v720_v47 = vpop.permute.xlu0 %719  ;;  %1066 = vrcp.f32 %v836_v15  ;;  %v810_v28 = vmul.f32 %v806_v23, %v706_v63 }
 0x243   : > { %v737_v20 = vadd.f32 %v1609_v11, %v720_v47 }
 0x244   : > { %v830_v24 = vpop.permute.xlu1 %829  ;;  %v1622_v8 = vmul.f32 %v706_v63, %v650_v7  ;;  %v838_v46 = vsub.f32 %v834_v53, %v810_v28 }
 0x245   : > { %v741_v55 = vsub.f32 %v737_v20, %v1746_v54  ;;  %v835_v21 = vadd.f32 %v830_v24, %v1609_v11 }
 0x247   : > { %1068 = vrcp.f32 %v741_v55  ;;  %v839_v36 = vsub.f32 %v835_v21, %v1611_v58 }
 0x249   : > { %v634_v38 = vpop.permute.xlu1 %633 }
 0x24a   : > { %v643_v31 = vmax.f32 %v634_v38, %v1744_v40 }
 0x24c   : > { %v647_v60 = vsub.f32 %v619_v34, %v643_v31 }
 0x24e   : > { %v651_v14 = vmax.f32 %v647_v60, 0.0  ;;  %v715_v0 = vpop.permute.xlu1 %714 }
 0x24f   : > { %v1067_v12 = vpop.eup %1066  ;;  %v736_v27 = vadd.f32 %v1609_v11, %v715_v0 }
 0x250   : > { %v711_v41 = vmul.f32 %v707_v1, %v651_v14  ;;  %v841_v44 = vmul.f32 %v1067_v12, %v808_v13  ;;  %v809_v1 = vmul.f32 %v805_v6, %v1749_v43  ;;  %v357_v12 = vsel %vm355_vm2, %v1589_v25, %v1743_v9 }
 0x251   : > { %v740_v57 = vsub.f32 %v736_v27, %v1467_v16 }
 0x252   : > { %v837_v30 = vsub.f32 %v833_v33, %v809_v1  ;;  %v725_v40 = vpop.permute.xlu1 %724  ;;  %v848_v10 = vsel %vm355_vm2, %v841_v44, -inf  ;;  %v359_v33 = vsel %vm355_vm2, %v1599_v4, %v1083_v22 }
 0x253   : > { %1070 = vrcp.f32 %v740_v57  ;;  %v738_v63 = vadd.f32 %v1609_v11, %v725_v40 }
 0x254   : > { %v1069_v50 = vpop.eup %1068  ;;  %1072 = vrcp.f32 %v837_v30 }
 0x255   : > { %v747_v52 = vmul.f32 %v1069_v50, %v1746_v54  ;;  %1074 = vrcp.f32 %v838_v46  ;;  %v742_v20 = vsub.f32 %v738_v63, %v1622_v8 }
 0x256   : > { %v730_v45 = vpop.permute.xlu1 %729  ;;  %1076 = vrcp.f32 %v839_v36 }
 0x257   : > { %898 = vrot.lane.b32.xlu1 %v747_v52, %s1102_s8  ;;  %v739_v29 = vadd.f32 %v1609_v11, %v730_v45  ;;  %v881_v11 = vpop.permute.xlu0 %880 }
 0x25a   : > { %v883_v38 = vpop.permute.xlu1 %882 }
 0x25b   : > { %v885_v31 = vpop.permute.xlu0 %884 }
 0x25f   : > { %v867_v14 = vpop.permute.xlu0 %866 }
 0x260   : > { %v1071_v3 = vpop.eup %1070 }
 0x261   : > { %v745_v59 = vmul.f32 %v1071_v3, %v1467_v16  ;;  %v1073_v48 = vpop.eup %1072  ;;  %v743_v16 = vsub.f32 %v739_v29, %v711_v41  ;;  %v348_v3 = vsel %vm345_vm0, %v1384_v56, %v1084_v37 }
 0x262   : > { %v843_v51 = vmul.f32 %v1073_v48, %v809_v1  ;;  %v1075_v5 = vpop.eup %1074  ;;  %v353_v1 = vsel %vm350_vm1, %v348_v3, %v1596_v35 }
 0x263   : > { %896 = vrot.lane.b32.xlu0 %v745_v59, %s1102_s8  ;;  %1078 = vrcp.f32 %v743_v16  ;;  %v845_v13 = vmul.f32 %v1075_v5, %v810_v28  ;;  %v1077_v32 = vpop.eup %1076  ;;  %v358_v30 = vsel %vm355_vm2, %v353_v1, %v1084_v37 }
 0x264   : > { %v851_v17 = vsel %vm355_vm2, %v843_v51, -inf  ;;  %v847_v15 = vmul.f32 %v1077_v32, %v1611_v58  ;;  %1080 = vrcp.f32 %v742_v20  ;;  %v887_v58 = vpop.permute.xlu1 %886 }
 0x265   : > { %v854_v62 = vsel %vm355_vm2, %v845_v13, -inf }
 0x266   : > { %v857_v47 = vsel %vm355_vm2, %v847_v15, -inf }
 0x268   : > { %v865_v2 = vpop.permute.xlu1 %864 }
 0x26c   : > { %v869_v34 = vpop.permute.xlu1 %868 }
 0x26d   : > { %v911_v28 = vsel %vm908_vm3, %v358_v30, %v869_v34 }
 0x26e   : > { %v916_v40 = vsel %vm913_vm4, %v911_v28, %v885_v31 }
 0x270   : > { %v1079_v7 = vpop.eup %1078  ;;  %v871_v60 = vpop.permute.xlu1 %870 }
 0x271   : > { %v751_v24 = vmul.f32 %v1079_v7, %v711_v41  ;;  %v1081_v54 = vpop.eup %1080  ;;  %v910_v41 = vsel %vm908_vm3, %v357_v12, %v867_v14  ;;  %v912_v42 = vsel %vm908_vm3, %v359_v33, %v871_v60 }
 0x272   : > { %v749_v55 = vmul.f32 %v1081_v54, %v1622_v8  ;;  %v1082_v8 = vld [vmem:[%s1714_s1] sm:$0xff]  ;;  %v915_v57 = vsel %vm913_vm4, %v910_v41, %v883_v38  ;;  %v917_v59 = vsel %vm913_vm4, %v912_v42, %v887_v58 }
 0x273   : > { %v346_v27 = vsel %vm345_vm0, %v1381_v49, %v1082_v8 }
 0x274   : > { %v351_v44 = vsel %vm350_vm1, %v346_v27, %v1591_v26 }
 0x275   : > { %v356_v50 = vsel %vm355_vm2, %v351_v44, %v1082_v8 }
 0x276   : > { %v909_v26 = vsel %vm908_vm3, %v356_v50, %v865_v2 }
 0x277   : > { %v914_v39 = vsel %vm913_vm4, %v909_v26, %v881_v11 }
 0x27b   : > { %852 = vmax.xlane.f32.xlu1 %v851_v17 }
 0x282   : > { %849 = vmax.xlane.f32.xlu0 %v848_v10 }
 0x286   : > { %855 = vmax.xlane.f32.xlu0 %v854_v62 }
 0x28a   : > { %858 = vmax.xlane.f32.xlu0 %v857_v47 }
 0x28c   : > { %902 = vrot.lane.b32.xlu1 %v751_v24, %s1102_s8 }
 0x2a0   : > { %900 = vrot.lane.b32.xlu0 %v749_v55, %s1102_s8 }
 0x2c9   : > { %v899_v0 = vpop.permute.xlu1 %898 }
 0x2ca   : > { %v920_v9 = vsel %vm918_vm5, %v915_v57, %v899_v0 }
 0x2d5   : > { %v897_v19 = vpop.permute.xlu0 %896 }
 0x2d6   : > { %v919_v52 = vsel %vm918_vm5, %v914_v39, %v897_v19 }
 0x304   : > { %v853_v49 = vpop.xlane.xlu1 %852 }
 0x305   : > { %v925_v25 = vsel %vm923_vm6, %v920_v9, %v853_v49 }
 0x306   : > { %930 = vst.msk [vmem:[%s1672_s15 + $0x8] sm:$0xff] %vm928_vm7, %v925_v25 }
 0x308   : > { %v903_v18 = vpop.permute.xlu1 %902 }
 0x309   : > { %v922_v4 = vsel %vm918_vm5, %v917_v59, %v903_v18 }
 0x30b   : > { %v850_v61 = vpop.xlane.xlu0 %849 }
 0x30c   : > { %v924_v6 = vsel %vm923_vm6, %v919_v52, %v850_v61 }
 0x30d   : > { %929 = vst.msk [vmem:[%s1672_s15] sm:$0xff] %vm928_vm7, %v924_v6 }
 0x30f   : > { %v856_v43 = vpop.xlane.xlu0 %855 }
 0x313   : > { %v859_v23 = vpop.xlane.xlu0 %858 }
 0x314   : > { %v927_v53 = vsel %vm923_vm6, %v922_v4, %v859_v23 }
 0x315   : > { %932 = vst.msk [vmem:[%s1672_s15 + $0x18] sm:$0xff] %vm928_vm7, %v927_v53 }
 0x317   : > { %v901_v56 = vpop.permute.xlu0 %900 }
 0x318   : > { %v921_v46 = vsel %vm918_vm5, %v916_v40, %v901_v56 }
 0x319   : > { %v926_v35 = vsel %vm923_vm6, %v921_v46, %v856_v43 }
 0x31a   : > { %931 = vst.msk [vmem:[%s1672_s15 + $0x10] sm:$0xff] %vm928_vm7, %v926_v35 }
 0x31b PF: > { %s13_s12 = sadd.s32 1, %s1091_s12  }
 0x31c   : > { %p10_p4 = scmp.ge.s32.totalorder %s13_s12, 4  }
 0x31e   :  { %12 = sbr.rel (!%p10_p4) target bundleno = 1 (0x1), region = 65 }

// kernel: forward_losses.5
= control target key start
LH: loop header
LB: loop body
LE: loop exit
PB: predicated region body
PF: predicated region fallthrough
CT: control target
= control target key end

     0   :  { %s1122_s22 = smov 2   ;;  %v1123_v4 = vmov 0   ;;  %s2115_s0 = inlined_call_operand.vmem [shape: f32[64,4], index: 0, kind: input, shape index: {}]   ;;  %s2116_s1 = inlined_call_operand.vmem [shape: s32[64,1], index: 1, kind: input, shape index: {}]   ;;  %s2117_s2 = inlined_call_operand.vmem [shape: f32[48,4], index: 2, kind: input, shape index: {}]   ;;  %s2118_s3 = inlined_call_operand.vmem [shape: f32[48,4], index: 3, kind: input, shape index: {}]   ;;  %s2119_s4 = inlined_call_operand.vmem [shape: f32[48,1], index: 4, kind: input, shape index: {}]   ;;  %s2120_s5 = inlined_call_operand.vmem [shape: f32[2], index: 5, kind: output, shape index: {}]  }
   0x1   :  { %v1162_v0 = vld [vmem:[%s2118_s3] sm:$0xff]  ;;  %v1176_v2 = vld [vmem:[%s2118_s3 + $0x8] sm:$0xff]  ;;  %996 = vset.pattern.permute.xlu1 %v1123_v4  ;;  %997 = vset.pattern.permute.xlu0 %v1123_v4  ;;  %v1204_v7 = vld [vmem:[%s2118_s3 + $0x10] sm:$0xff] }
   0x2   :  { %v1167_v1 = vld [vmem:[%s2117_s2] sm:$0xff]  ;;  %628 = vrot.lane.b32.xlu1 %v1162_v0, %s1122_s22  ;;  %v1181_v3 = vld [vmem:[%s2117_s2 + $0x8] sm:$0xff]  ;;  %v1209_v8 = vld [vmem:[%s2117_s2 + $0x10] sm:$0xff] }
   0x3   :  { %568 = vrot.lane.b32.xlu0 %v1167_v1, %s1122_s22  ;;  %v1191_v5 = vmax.f32 %v1181_v3, %v1176_v2  ;;  %v1195_v6 = vmax.f32 %v1167_v1, %v1162_v0 }
   0x6   :  { %630 = vrot.lane.b32.xlu1 %v1176_v2, %s1122_s22 }
   0x7   :  { %570 = vrot.lane.b32.xlu0 %v1181_v3, %s1122_s22 }
   0xa   :  { %702 = vrot.lane.b32.xlu1 %v1191_v5, %s1122_s22 }
   0xb   :  { %700 = vrot.lane.b32.xlu0 %v1195_v6, %s1122_s22 }
   0xc   :  { %10 = vsyncpa [#allocation3], 0  ;;  %v1217_v9 = vmax.f32 %v1209_v8, %v1204_v7  ;;  %v1221_v10 = vmin.f32 %v1167_v1, %v1162_v0  ;;  %v1229_v11 = vmin.f32 %v1181_v3, %v1176_v2  ;;  %v1234_v12 = vld [vmem:[%s2117_s2 + $0x18] sm:$0xff]  ;;  %v1255_v15 = vmin.f32 %v1209_v8, %v1204_v7  ;;  %v1260_v16 = vld [vmem:[%s2117_s2 + $0x20] sm:$0xff]  ;;  %s1125_s26 = smov 127   ;;  %s956_s13 = sshll.u32 %s2120_s5, 4  ;;  %s957_s13 = int_to_ptr.vmem [resolvable:$true] %s956_s13 }
   0xd   :  { %v1239_v13 = vld [vmem:[%s2118_s3 + $0x18] sm:$0xff]  ;;  %v1265_v17 = vld [vmem:[%s2118_s3 + $0x20] sm:$0xff]  ;;  %v1286_v20 = vld [vmem:[%s2117_s2 + $0x28] sm:$0xff]  ;;  %v2121_v34 = vmov 0.0   ;;  %s1108_s17 = scalar_lea.vmem %s957_s13, 16  ;;  %p1113_p1 = scmp.lt.s32.totalorder %s957_s13, %s957_s13 }
   0xe   :  { %632 = vrot.lane.b32.xlu1 %v1204_v7, %s1122_s22  ;;  %v1247_v14 = vmax.f32 %v1234_v12, %v1239_v13  ;;  %v1273_v18 = vmax.f32 %v1260_v16, %v1265_v17  ;;  %v1281_v19 = vmin.f32 %v1234_v12, %v1239_v13  ;;  %v1291_v21 = vld [vmem:[%s2118_s3 + $0x28] sm:$0xff]  ;;  %v1305_v23 = vmin.f32 %v1260_v16, %v1265_v17  ;;  %v29_v25 = vld [vmem:[%s2116_s1] sm:$0xff]  ;;  %v31_v27 = vld [vmem:[%s2116_s1 + $0x10] sm:$0xff]  ;;  %p1109_p0 = scmp.ne.s32.totalorder %s957_s13, %s1108_s17  ;;  %p1114_p2 = scmp.lt.s32.totalorder %s1108_s17, %s1108_s17 }
   0xf   :  { %572 = vrot.lane.b32.xlu0 %v1209_v8, %s1122_s22  ;;  %v1299_v22 = vmax.f32 %v1286_v20, %v1291_v21  ;;  %v1311_v24 = vmin.f32 %v1286_v20, %v1291_v21  ;;  %vm37_vm0 = vcmp.ge.s32.totalorder %v29_v25, 0  ;;  %vm61_vm1 = vcmp.ne.s32.totalorder %v29_v25, 4  ;;  %v30_v26 = vld [vmem:[%s2116_s1 + $0x8] sm:$0xff]  ;;  %v1330_v28 = vld [vmem:[%s2116_s1 + $0x20] sm:$0xff]  ;;  %v32_v30 = vld [vmem:[%s2116_s1 + $0x18] sm:$0xff] }
  0x10   :  { %vm69_vm2 = vmand %vm37_vm0, %vm61_vm1  ;;  %vm38_vm3 = vcmp.ge.s32.totalorder %v30_v26, 0  ;;  %vm62_vm4 = vcmp.ne.s32.totalorder %v30_v26, 4  ;;  %vm39_vm6 = vcmp.ge.s32.totalorder %v31_v27, 0  ;;  %vm63_vm7 = vcmp.ne.s32.totalorder %v31_v27, 4  ;;  %p1115_p3 = por %p1114_p2, %p1113_p1 }
  0x11   :  { %v111_v29 = vsel %vm69_vm2, 1, %v1123_v4  ;;  %vm70_vm5 = vmand %vm38_vm3, %vm62_vm4  ;;  %vm41_vm8 = vcmp.ge.s32.totalorder %v1330_v28, 0  ;;  %vm65_vm9 = vcmp.ne.s32.totalorder %v1330_v28, 4  ;;  %vm40_vm12 = vcmp.ge.s32.totalorder %v32_v30, 0 }
  0x12   :  { %790 = vrot.lane.b32.xlu1 %v1221_v10, %s1122_s22  ;;  %v112_v31 = vsel %vm70_vm5, 1, %v1123_v4  ;;  %vm71_vm10 = vmand %vm39_vm6, %vm63_vm7  ;;  %vm64_vm13 = vcmp.ne.s32.totalorder %v32_v30, 4  ;;  %v1347_v35 = vsel %vm37_vm0, 1.0, %v2121_v34  ;;  %v1351_v36 = vsel %vm38_vm3, 1.0, %v2121_v34  ;;  %p1116_p4 = pnand %p1115_p3, %p1109_p0 }
  0x13   :  { %704 = vrot.lane.b32.xlu0 %v1217_v9, %s1122_s22  ;;  %vm73_vm11 = vmand %vm41_vm8, %vm65_vm9  ;;  %v113_v32 = vsel %vm71_vm10, 1, %v1123_v4  ;;  %v1356_v38 = vsel %vm39_vm6, 1.0, %v2121_v34  ;;  %v1359_v39 = vsel %vm40_vm12, 1.0, %v2121_v34  ;;  %v998_v40 = vpack.i.bf16 %v1351_v36, %v1347_v35 }
  0x14   :  { %v115_v33 = vsel %vm73_vm11, 1, %v1123_v4  ;;  %vm72_vm14 = vmand %vm40_vm12, %vm64_vm13  ;;  %v1003_v41 = vpack.i.bf16 %v1359_v39, %v1356_v38  ;;  %vm167_vm6 = vcmask 31744   ;;  %v1566_v39 = vld [vmem:[%s2115_s0] sm:$0xff] }
  0x15   :  { %v114_v37 = vsel %vm72_vm14, 1, %v1123_v4 }
  0x16   :  { %574 = vrot.lane.b32.xlu1 %v1234_v12, %s1122_s22 }
  0x17   :  { %792 = vrot.lane.b32.xlu0 %v1229_v11, %s1122_s22 }
  0x1a   :  { %706 = vrot.lane.b32.xlu1 %v1247_v14, %s1122_s22 }
  0x1b   :  { %634 = vrot.lane.b32.xlu0 %v1239_v13, %s1122_s22 }
  0x1e   :  { %576 = vrot.lane.b32.xlu1 %v1260_v16, %s1122_s22 }
  0x1f   :  { %794 = vrot.lane.b32.xlu0 %v1255_v15, %s1122_s22 }
  0x22   :  { %708 = vrot.lane.b32.xlu1 %v1273_v18, %s1122_s22 }
  0x23   :  { %636 = vrot.lane.b32.xlu0 %v1265_v17, %s1122_s22 }
  0x26   :  { %578 = vrot.lane.b32.xlu1 %v1286_v20, %s1122_s22 }
  0x27   :  { %796 = vrot.lane.b32.xlu0 %v1281_v19, %s1122_s22 }
  0x2a   :  { %710 = vrot.lane.b32.xlu1 %v1299_v22, %s1122_s22 }
  0x2b   :  { %638 = vrot.lane.b32.xlu0 %v1291_v21, %s1122_s22 }
  0x2e   :  { %800 = vrot.lane.b32.xlu1 %v1311_v24, %s1122_s22 }
  0x2f   :  { %798 = vrot.lane.b32.xlu0 %v1305_v23, %s1122_s22 }
  0x32   :  { %80 = vperm.xlu1 %996, %v29_v25  }
  0x33   :  { %83 = vperm.xlu0 %997, %v30_v26  }
  0x36   :  { %120 = vperm.xlu1 %996, %v111_v29  }
  0x37   :  { %86 = vperm.xlu0 %997, %v31_v27  }
  0x3a   :  { %123 = vperm.xlu1 %996, %v112_v31  }
  0x3b   :  { %89 = vperm.xlu0 %997, %v32_v30  }
  0x3e   :  { %126 = vperm.xlu1 %996, %v113_v32  }
  0x3f   :  { %132 = vperm.xlu0 %997, %v115_v33  }
  0x42   :  { %129 = vperm.xlu1 %996, %v114_v37  }
  0x46   :  { %92 = vperm.xlu1 %996, %v1330_v28  }
  0x74   :  { %v629_v42 = vpop.permute.xlu1 %628 }
  0x75   :  { %v569_v43 = vpop.permute.xlu0 %568  ;;  %v1372_v47 = vsub.f32 %v1162_v0, %v629_v42 }
  0x76   :  { %v1367_v44 = vsub.f32 %v1167_v1, %v569_v43 }
  0x78   :  { %598 = vrot.lane.b32.xlu0 %v1367_v44, %s1125_s26  ;;  %v631_v45 = vpop.permute.xlu1 %630 }
  0x79   :  { %v571_v46 = vpop.permute.xlu0 %570  ;;  %v1382_v51 = vsub.f32 %v1176_v2, %v631_v45 }
  0x7a   :  { %v1375_v48 = vsub.f32 %v1181_v3, %v571_v46 }
  0x7c   :  { %658 = vrot.lane.b32.xlu0 %v1372_v47, %s1125_s26  ;;  %600 = vrot.lane.b32.xlu1 %v1375_v48, %s1125_s26  ;;  %v703_v49 = vpop.permute.xlu1 %702 }
  0x7d   :  { %v701_v50 = vpop.permute.xlu0 %700  ;;  %v719_v27 = vsub.f32 %v1229_v11, %v703_v49 }
  0x7e   :  { %v718_v25 = vsub.f32 %v1221_v10, %v701_v50  ;;  %v1468_v50 = vld [vmem:[%s2116_s1 + $0x28] sm:$0xff] }
  0x7f   :  { %v1433_v10 = vmax.f32 %v719_v27, 0.0  ;;  %vm42_vm15 = vcmp.ge.s32.totalorder %v1468_v50, 0  ;;  %vm66_vm0 = vcmp.ne.s32.totalorder %v1468_v50, 4 }
  0x80   :  { %660 = vrot.lane.b32.xlu1 %v1382_v51, %s1125_s26  ;;  %v633_v52 = vpop.permute.xlu1 %632  ;;  %v1423_v29 = vmax.f32 %v718_v25, 0.0  ;;  %vm74_vm2 = vmand %vm42_vm15, %vm66_vm0 }
  0x81   :  { %v573_v53 = vpop.permute.xlu0 %572  ;;  %v1387_v54 = vsub.f32 %v1204_v7, %v633_v52 }
  0x82   :  { %v1390_v55 = vsub.f32 %v1209_v8, %v573_v53 }
  0x84   :  { %602 = vrot.lane.b32.xlu0 %v1390_v55, %s1125_s26  ;;  %662 = vrot.lane.b32.xlu1 %v1387_v54, %s1125_s26  ;;  %v791_v57 = vpop.permute.xlu1 %790 }
  0x85   :  { %v705_v56 = vpop.permute.xlu0 %704  ;;  %v808_v31 = vsub.f32 %v1195_v6, %v791_v57  ;;  %v77_v6 = vlaneseq }
  0x87   :  { %v1470_v52 = vand.u32 127, %v77_v6  ;;  %v969_v6 = vsel %vm41_vm8, 1.0, %v2121_v34 }
  0x88   :  { %v575_v59 = vpop.permute.xlu1 %574 }
  0x89   :  { %v793_v58 = vpop.permute.xlu0 %792  ;;  %v1397_v60 = vsub.f32 %v1234_v12, %v575_v59  ;;  %2153 = vst [vmem:[#allocation7_spill] sm:$0xff] %v1470_v52  ;;  %v35_v59 = vld [vmem:[%s2116_s1 + $0x30] sm:$0xff] }
  0x8a   :  { %v809_v11 = vsub.f32 %v1191_v5, %v793_v58  ;;  %vm43_vm7 = vcmp.ge.s32.totalorder %v35_v59, 0  ;;  %vm67_vm9 = vcmp.ne.s32.totalorder %v35_v59, 4 }
  0x8b   :  { %604 = vrot.lane.b32.xlu0 %v1397_v60, %s1125_s26  ;;  %vm75_vm13 = vmand %vm43_vm7, %vm67_vm9  ;;  %v971_v28 = vsel %vm43_vm7, 1.0, %v2121_v34 }
  0x8c   :  { %v707_v62 = vpop.permute.xlu1 %706 }
  0x8d   :  { %v635_v61 = vpop.permute.xlu0 %634  ;;  %v721_v32 = vsub.f32 %v1281_v19, %v707_v62  ;;  %v116_v62 = vsel %vm74_vm2, 1, %v1123_v4 }
  0x8e   :  { %v1402_v63 = vsub.f32 %v1239_v13, %v635_v61 }
  0x8f   :  { %v1453_v42 = vmax.f32 %v721_v32, 0.0 }
  0x90   :  { %664 = vrot.lane.b32.xlu1 %v1402_v63, %s1125_s26  ;;  %v577_v1 = vpop.permute.xlu1 %576 }
  0x91   :  { %v795_v0 = vpop.permute.xlu0 %794  ;;  %v1407_v2 = vsub.f32 %v1260_v16, %v577_v1 }
  0x92   :  { %v810_v33 = vsub.f32 %v1217_v9, %v795_v0 }
  0x94   :  { %606 = vrot.lane.b32.xlu1 %v1407_v2, %s1125_s26  ;;  %v709_v7 = vpop.permute.xlu1 %708  ;;  %v1455_v43 = vmax.f32 %v810_v33, 0.0 }
  0x95   :  { %v637_v3 = vpop.permute.xlu0 %636  ;;  %v722_v45 = vsub.f32 %v1305_v23, %v709_v7 }
  0x96   :  { %v1412_v8 = vsub.f32 %v1265_v17, %v637_v3  ;;  %v720_v17 = vsub.f32 %v1255_v15, %v705_v56  ;;  %v1443_v15 = vmax.f32 %v808_v31, 0.0 }
  0x97   :  { %v1472_v23 = vmax.f32 %v722_v45, 0.0  ;;  %v970_v45 = vsel %vm42_vm15, 1.0, %v2121_v34 }
  0x98   :  { %666 = vrot.lane.b32.xlu0 %v1412_v8, %s1125_s26  ;;  %v579_v13 = vpop.permute.xlu1 %578 }
  0x99   :  { %v797_v12 = vpop.permute.xlu0 %796  ;;  %v1418_v26 = vsub.f32 %v1286_v20, %v579_v13  ;;  %v1435_v20 = vmax.f32 %v720_v17, 0.0  ;;  %v117_v17 = vsel %vm75_vm13, 1, %v1123_v4 }
  0x9a   :  { %v811_v46 = vsub.f32 %v1247_v14, %v797_v12 }
  0x9b   :  { %2151 = vst [vmem:[#allocation5_spill] sm:$0xff] %v1418_v26 }
  0x9c   :  { %608 = vrot.lane.b32.xlu0 %v1418_v26, %s1125_s26  ;;  %v711_v37 = vpop.permute.xlu1 %710  ;;  %v1474_v14 = vmax.f32 %v811_v46, 0.0 }
  0x9d   :  { %v639_v16 = vpop.permute.xlu0 %638  ;;  %v723_v49 = vsub.f32 %v1311_v24, %v711_v37 }
  0x9e   :  { %v1427_v30 = vsub.f32 %v1291_v21, %v639_v16  ;;  %v1445_v21 = vmax.f32 %v809_v11, 0.0 }
  0x9f   :  { %v1480_v24 = vmax.f32 %v723_v49, 0.0 }
  0xa0   :  { %2152 = vst [vmem:[#allocation6_spill] sm:$0xff] %v1427_v30  ;;  %736 = vrot.lane.b32.xlu0 %v1423_v29, %s1125_s26  ;;  %668 = vrot.lane.b32.xlu1 %v1427_v30, %s1125_s26  ;;  %v801_v19 = vpop.permute.xlu1 %800 }
  0xa1   :  { %v799_v5 = vpop.permute.xlu0 %798  ;;  %2154 = vst [vmem:[#allocation8_spill] sm:$0xff] %v1480_v24  ;;  %v813_v58 = vsub.f32 %v1299_v22, %v801_v19  ;;  %v36_v22 = vld [vmem:[%s2116_s1 + $0x38] sm:$0xff]  ;;  %s1127_s1 = smov 1.0  }
  0xa2   :  { %v812_v9 = vsub.f32 %v1273_v18, %v799_v5  ;;  %vm44_vm14 = vcmp.ge.s32.totalorder %v36_v22, 0  ;;  %vm68_vm0 = vcmp.ne.s32.totalorder %v36_v22, 4 }
  0xa3   :  { %v1502_v3 = vmax.f32 %v813_v58, 0.0  ;;  %v972_v49 = vsel %vm44_vm14, 1.0, %v2121_v34  ;;  %v264_v58 = vand.u32 2147483647, %v1566_v39 }
  0xa4   :  { %740 = vrot.lane.b32.xlu0 %v1435_v20, %s1125_s26  ;;  %738 = vrot.lane.b32.xlu1 %v1433_v10, %s1125_s26  ;;  %v1478_v18 = vmax.f32 %v812_v9, 0.0  ;;  %v1008_v9 = vpack.i.bf16 %v970_v45, %v969_v6 }
  0xa5   :  { %2155 = vst [vmem:[#allocation9_spill] sm:$0xff] %v1502_v3 }
  0xa8   :  { %828 = vrot.lane.b32.xlu0 %v1445_v21, %s1125_s26  ;;  %826 = vrot.lane.b32.xlu1 %v1443_v15, %s1125_s26 }
  0xac   :  { %830 = vrot.lane.b32.xlu0 %v1455_v43, %s1125_s26  ;;  %742 = vrot.lane.b32.xlu1 %v1453_v42, %s1125_s26 }
  0xad   :  { %v81_v53 = vpop.permute.xlu1 %80 }
  0xae   :  { %v84_v56 = vpop.permute.xlu0 %83  ;;  %vm103_vm1 = vcmp.eq.s32.totalorder %v1470_v52, %v81_v53 }
  0xaf   :  { %vm104_vm5 = vcmp.eq.s32.totalorder %v1470_v52, %v84_v56  ;;  %v1576_v56 = vld [vmem:[%s2115_s0 + $0x10] sm:$0xff] }
  0xb0   :  { %744 = vrot.lane.b32.xlu0 %v1472_v23, %s1125_s26  ;;  %832 = vrot.lane.b32.xlu1 %v1474_v14, %s1125_s26 }
  0xb1   :  { %v121_v57 = vpop.permute.xlu1 %120 }
  0xb2   :  { %vm143_vm3 = vcmp.eq.s32.totalorder %v121_v57, 1  ;;  %v87_v61 = vpop.permute.xlu0 %86  ;;  %v973_v57 = vmul.f32 -1.442695, %v1566_v39 }
  0xb3   :  { %vm151_vm4 = vmand %vm143_vm3, %vm103_vm1  ;;  %vm105_vm12 = vcmp.eq.s32.totalorder %v1470_v52, %v87_v61 }
  0xb4   :  { %746 = vrot.lane.b32.xlu0 %v1480_v24, %s1125_s26  ;;  %834 = vrot.lane.b32.xlu1 %v1478_v18, %s1125_s26  ;;  %v1500_v1 = vsel %vm151_vm4, 1.0, %v2121_v34  ;;  %vm76_vm4 = vmand %vm44_vm14, %vm68_vm0  ;;  %1018 = vpow2.f32 %v973_v57 }
  0xb5   :  { %v124_v0 = vpop.permute.xlu1 %123  ;;  %v168_v7 = vsel %vm167_vm6, %v1500_v1, 0.0  ;;  %v118_v46 = vsel %vm76_vm4, 1, %v1123_v4  ;;  %v1013_v4 = vpack.i.bf16 %v972_v49, %v971_v28 }
  0xb6   :  { %vm144_vm10 = vcmp.eq.s32.totalorder %v124_v0, 1  ;;  %v90_v25 = vpop.permute.xlu0 %89 }
  0xb7   :  { %vm152_vm11 = vmand %vm144_vm10, %vm104_vm5  ;;  %vm106_vm3 = vcmp.eq.s32.totalorder %v1470_v52, %v90_v25  ;;  %v1593_v25 = vld [vmem:[%s2115_s0 + $0x20] sm:$0xff] }
  0xb8   :  { %135 = vperm.xlu0 %997, %v116_v62   ;;  %95 = vperm.xlu1 %996, %v1468_v50   ;;  %v1512_v12 = vsel %vm152_vm11, 1.0, %v2121_v34  ;;  %v975_v62 = vmul.f32 -1.442695, %v1576_v56  ;;  %2163 = vst [vmem:[#allocation15_spill] sm:$0xff] %v1593_v25 }
  0xb9   :  { %v169_v13 = vsel %vm167_vm6, %v1512_v12, 0.0  ;;  %v127_v16 = vpop.permute.xlu1 %126 }
  0xba   :  { %v170_v27 = vadd.f32 %v169_v13, %v168_v7  ;;  %vm145_vm1 = vcmp.eq.s32.totalorder %v127_v16, 1  ;;  %v133_v37 = vpop.permute.xlu0 %132  ;;  %v266_v13 = vand.u32 2147483647, %v1576_v56 }
  0xbb   :  { %vm153_vm2 = vmand %vm145_vm1, %vm105_vm12  ;;  %vm147_vm10 = vcmp.eq.s32.totalorder %v133_v37, 1  ;;  %v977_v37 = vmul.f32 -1.442695, %v1593_v25 }
  0xbc   :  { %836 = vrot.lane.b32.xlu0 %v1502_v3, %s1125_s26  ;;  %98 = vperm.xlu1 %996, %v35_v59   ;;  %v1522_v31 = vsel %vm153_vm2, 1.0, %v2121_v34  ;;  %v1583_v59 = vld [vmem:[%s2115_s0 + $0x18] sm:$0xff] }
  0xbd   :  { %2156 = vst [vmem:[#allocation10_spill] sm:$0xff] %v1522_v31  ;;  %v171_v11 = vsel %vm167_vm6, %v1522_v31, 0.0  ;;  %v130_v32 = vpop.permute.xlu1 %129  ;;  %2162 = vst [vmem:[#allocation14_spill] sm:$0xff] %v1583_v59  ;;  %v976_v0 = vmul.f32 -1.442695, %v1583_v59 }
  0xbe   :  { %v172_v33 = vadd.f32 %v171_v11, %v170_v27  ;;  %vm146_vm5 = vcmp.eq.s32.totalorder %v130_v32, 1  ;;  %v267_v16 = vand.u32 2147483647, %v1583_v59  ;;  %v268_v11 = vand.u32 2147483647, %v1593_v25 }
  0xbf   :  { %vm1527_vm9 = vmand %vm146_vm5, %vm106_vm3  ;;  %v274_v32 = vsub.f32 0.0, %v266_v13 }
  0xc0   :  { %138 = vperm.xlu0 %997, %v117_v17   ;;  %101 = vperm.xlu1 %996, %v36_v22   ;;  %v1552_v35 = vsel %vm1527_vm9, 1.0, %v2121_v34  ;;  %v272_v22 = vsub.f32 0.0, %v264_v58  ;;  %v276_v6 = vsub.f32 0.0, %v268_v11 }
  0xc1   :  { %v93_v19 = vpop.permute.xlu1 %92  ;;  %2159 = vst [vmem:[#allocation11_spill] sm:$0xff] %v1552_v35  ;;  %v173_v36 = vsel %vm167_vm6, %v1552_v35, 0.0  ;;  %v284_v45 = vmul.f32 1.442695, %v274_v32 }
  0xc2   :  { %vm107_vm11 = vcmp.eq.s32.totalorder %v1470_v52, %v93_v19  ;;  %v174_v50 = vadd.f32 %v173_v36, %v172_v33  ;;  %v280_v27 = vmul.f32 1.442695, %v272_v22  ;;  %v275_v33 = vsub.f32 0.0, %v267_v16  ;;  %v1019_v19 = vpop.eup %1018 }
  0xc3   :  { %vm155_vm12 = vmand %vm147_vm10, %vm107_vm11  ;;  %v216_v36 = vadd.f32 1.0, %v1019_v19 }
  0xc4   :  { %141 = vperm.xlu0 %997, %v118_v46   ;;  %999 = vperm.xlu1 %996, %v998_v40   ;;  %v1557_v40 = vsel %vm155_vm12, 1.0, %v2121_v34  ;;  %v286_v46 = vmul.f32 1.442695, %v275_v33 }
  0xc5   :  { %2160 = vst [vmem:[#allocation12_spill] sm:$0xff] %v1557_v40  ;;  %v175_v53 = vsel %vm167_vm6, %v1557_v40, 0.0 }
  0xc6   :  { %v1561_v38 = vadd.f32 %v175_v53, %v174_v50 }
  0xc8   :  { %1004 = vperm.xlu0 %997, %v1003_v41   ;;  %1009 = vperm.xlu1 %996, %v1008_v9   ;;  %2161 = vst [vmem:[#allocation13_spill] sm:$0xff] %v1561_v38  ;;  %v1571_v41 = vld [vmem:[%s2115_s0 + $0x8] sm:$0xff]  ;;  %v288_v9 = vmul.f32 1.442695, %v276_v6 }
  0xc9   :  { %v974_v61 = vmul.f32 -1.442695, %v1571_v41  ;;  %v265_v7 = vand.u32 2147483647, %v1571_v41 }
  0xcb   :  { %1020 = vpow2.f32 %v974_v61  ;;  %v273_v17 = vsub.f32 0.0, %v265_v7  ;;  %v1609_v7 = vld [vmem:[%s2115_s0 + $0x28] sm:$0xff] }
  0xcc   :  { %1014 = vperm.xlu0 %997, %v1013_v4   ;;  %1022 = vpow2.f32 %v975_v62  ;;  %2164 = vst [vmem:[#allocation16_spill] sm:$0xff] %v1609_v7  ;;  %v269_v11 = vand.u32 2147483647, %v1609_v7 }
  0xcd   :  { %1024 = vpow2.f32 %v976_v0  ;;  %v282_v5 = vmul.f32 1.442695, %v273_v17 }
  0xce   :  { %1026 = vpow2.f32 %v280_v27 }
  0xcf   :  { %1028 = vpow2.f32 %v977_v37 }
  0xd0   :  { %1030 = vpow2.f32 %v282_v5 }
  0xd1   :  { %1032 = vpow2.f32 %v284_v45  ;;  %v1627_v45 = vld [vmem:[%s2115_s0 + $0x30] sm:$0xff] }
  0xd2   :  { %1034 = vpow2.f32 %v286_v46  ;;  %2165 = vst [vmem:[#allocation17_spill] sm:$0xff] %v1627_v45 }
  0xd3   :  { %1036 = vpow2.f32 %v288_v9  ;;  %v277_v9 = vsub.f32 0.0, %v269_v11 }
  0xd4   :  { %1038 = vrcp.f32 %v216_v36  ;;  %v978_v36 = vmul.f32 -1.442695, %v1609_v7 }
  0xd5   :  { %v290_v11 = vmul.f32 1.442695, %v277_v9  ;;  %v979_v9 = vmul.f32 -1.442695, %v1627_v45 }
  0xd8   :  { %v1021_v28 = vpop.eup %1020 }
  0xd9   :  { %v1023_v49 = vpop.eup %1022  ;;  %v217_v57 = vadd.f32 1.0, %v1021_v28 }
  0xda   :  { %v1025_v4 = vpop.eup %1024  ;;  %v218_v58 = vadd.f32 1.0, %v1023_v49 }
  0xdb   :  { %v219_v61 = vadd.f32 1.0, %v1025_v4  ;;  %v1602_v62 = vpop.eup %1026  ;;  %1040 = vrcp.f32 %v217_v57  ;;  %v270_v57 = vand.u32 2147483647, %v1627_v45 }
  0xdc   :  { %1042 = vrcp.f32 %v218_v58  ;;  %v1029_v13 = vpop.eup %1028  ;;  %v296_v16 = vadd.f32 1.0, %v1602_v62  ;;  %v299_v3 = vmul.f32 -0.5, %v1602_v62 }
  0xdd   :  { %1044 = vrcp.f32 %v219_v61  ;;  %v1612_v27 = vpop.eup %1030  ;;  %v220_v33 = vadd.f32 1.0, %v1029_v13 }
  0xde   :  { %v1617_v32 = vpop.eup %1032  ;;  %1046 = vlog2.f32 %v296_v16  ;;  %v305_v6 = vadd.f32 1.0, %v1612_v27  ;;  %v308_v7 = vmul.f32 -0.5, %v1612_v27  ;;  %v300_v30 = vadd.f32 1.0, %v299_v3 }
  0xdf   :  { %v1619_v37 = vpop.eup %1034  ;;  %v314_v28 = vadd.f32 1.0, %v1617_v32  ;;  %1048 = vrcp.f32 %v220_v33  ;;  %v311_v25 = vand.u32 2147483647, %v1612_v27 }
  0xe0   :  { %v1629_v46 = vpop.eup %1036  ;;  %v323_v49 = vadd.f32 1.0, %v1619_v37  ;;  %1050 = vlog2.f32 %v305_v6  ;;  %v1654_v6 = vld [vmem:[%s2115_s0 + $0x38] sm:$0xff]  ;;  %v309_v40 = vadd.f32 1.0, %v308_v7  ;;  %s1126_s0 = smov 126  }
  0xe1   :  { %v1639_v58 = vpop.eup %1038  ;;  %v332_v61 = vadd.f32 1.0, %v1629_v46  ;;  %1052 = vlog2.f32 %v314_v28  ;;  %2166 = vst [vmem:[#allocation18_spill] sm:$0xff] %v1654_v6  ;;  %v278_v28 = vsub.f32 0.0, %v270_v57  ;;  %v317_v57 = vmul.f32 -0.5, %v1617_v32 }
  0xe2   :  { %1054 = vlog2.f32 %v323_v49  ;;  %v980_v49 = vmul.f32 -1.442695, %v1654_v6  ;;  %v335_v35 = vmul.f32 -0.5, %v1629_v46  ;;  %vm1728_vm15 = vcmp.lt.f32.partialorder %v311_v25, 0.0004427343 }
  0xe3   :  { %1056 = vpow2.f32 %v978_v36  ;;  %v271_v36 = vand.u32 2147483647, %v1654_v6  ;;  %v326_v6 = vmul.f32 -0.5, %v1619_v37 }
  0xe4   :  { %1058 = vlog2.f32 %v332_v61  ;;  %v292_v61 = vmul.f32 1.442695, %v278_v28 }
  0xe5   :  { %1060 = vpow2.f32 %v290_v11  ;;  %v279_v38 = vsub.f32 0.0, %v271_v36 }
  0xe6   :  { %1062 = vpow2.f32 %v979_v9  ;;  %v318_v9 = vadd.f32 1.0, %v317_v57 }
  0xe7   :  { %1064 = vpow2.f32 %v980_v49  ;;  %v1694_v49 = vmul.f32 %v1602_v62, %v300_v30  ;;  %v1707_v30 = vmul.f32 %v1612_v27, %v309_v40  ;;  %v2185_v40 = vld [vmem:[#allocation11_spill] sm:$0xff] }
  0xe8   :  { %v1642_v13 = vpop.eup %1040  ;;  %1066 = vpow2.f32 %v292_v61  ;;  %v294_v61 = vmul.f32 1.442695, %v279_v38 }
  0xe9   :  { %v1646_v33 = vpop.eup %1042 }
  0xea   :  { %v1598_v50 = vpop.permute.xlu0 %598  ;;  %v1656_v52 = vpop.eup %1044  ;;  %1068 = vpow2.f32 %v294_v61 }
  0xeb   :  { %v1047_v11 = vpop.eup %1046  ;;  %v616_v3 = vmul.f32 %v1598_v50, %v1367_v44 }
  0xec   :  { %v1689_v7 = vpop.eup %1048  ;;  %v1691_v34 = vmul.f32 0.6931472, %v1047_v11 }
  0xed   :  { %v1051_v44 = vpop.eup %1050 }
  0xee   :  { %v1600_v53 = vpop.permute.xlu1 %600  ;;  %v659_v0 = vpop.permute.xlu0 %658  ;;  %v1726_v27 = vmul.f32 0.6931472, %v1051_v44 }
  0xef   :  { %v676_v59 = vmul.f32 %v659_v0, %v1372_v47  ;;  %v320_v0 = vand.u32 2147483647, %v1617_v32 }
  0xf1   :  { %v760_v50 = vadd.f32 %v676_v59, %v616_v3  ;;  %v1053_v59 = vpop.eup %1052  ;;  %vm1735_vm7 = vcmp.lt.f32.partialorder %v320_v0, 0.0004427343 }
  0xf2   :  { %v1604_v22 = vpop.permute.xlu1 %660  ;;  %v1742_v44 = vmul.f32 0.6931472, %v1053_v59 }
  0xf3   :  { %v677_v28 = vmul.f32 %v1604_v22, %v1382_v51  ;;  %v617_v51 = vmul.f32 %v1600_v53, %v1375_v48  ;;  %v1055_v53 = vpop.eup %1054 }
  0xf5   :  { %v761_v11 = vadd.f32 %v677_v28, %v617_v51 }
  0xf6   :  { %v1614_v17 = vpop.permute.xlu0 %602  ;;  %v1621_v5 = vpop.permute.xlu1 %662 }
  0xf7   :  { %v678_v22 = vmul.f32 %v1621_v5, %v1387_v54 }
  0xfd   :  { %v1631_v19 = vpop.permute.xlu0 %604 }
 0x102   :  { %v1635_v4 = vpop.permute.xlu1 %664 }
 0x103   :  { %v679_v3 = vmul.f32 %v1635_v4, %v1402_v63  ;;  %v619_v4 = vmul.f32 %v1631_v19, %v1397_v60 }
 0x105   :  { %v763_v61 = vadd.f32 %v679_v3, %v619_v4 }
 0x106   :  { %v1663_v24 = vpop.permute.xlu1 %606 }
 0x10a   :  { %v1644_v16 = vpop.permute.xlu0 %666 }
 0x10e   :  { %v1665_v26 = vpop.permute.xlu0 %608 }
 0x10f   :  { %2167 = vst [vmem:[#allocation19_spill] sm:$0xff] %v1665_v26  ;;  %v302_v26 = vand.u32 2147483647, %v1602_v62  ;;  %v327_v62 = vadd.f32 1.0, %v326_v6  ;;  %v329_v6 = vand.u32 2147483647, %v1619_v37 }
 0x111   :  { %vm1696_vm8 = vcmp.lt.f32.partialorder %v302_v26, 0.0004427343  ;;  %v1710_v26 = vmul.f32 %v1617_v32, %v318_v9  ;;  %v1057_v32 = vpop.eup %1056  ;;  %vm1771_vm13 = vcmp.lt.f32.partialorder %v329_v6, 0.0004427343 }
 0x112   :  { %v737_v45 = vpop.permute.xlu0 %736  ;;  %v1678_v31 = vpop.permute.xlu1 %668 }
 0x113   :  { %v1686_v47 = vmul.f32 %v737_v45, %v1423_v29  ;;  %v618_v29 = vmul.f32 %v1614_v17, %v1390_v55  ;;  %v1059_v9 = vpop.eup %1058 }
 0x114   :  { %v1747_v51 = vpop.eup %1060  ;;  %v1785_v6 = vmul.f32 0.6931472, %v1059_v9 }
 0x115   :  { %v1713_v48 = vsub.f32 %v760_v50, %v1686_v47  ;;  %v1745_v50 = vmul.f32 %v1619_v37, %v327_v62  ;;  %2174 = vst [vmem:[#allocation20_spill] sm:$0xff] %v1747_v51  ;;  %v221_v37 = vadd.f32 1.0, %v1057_v32 }
 0x116   :  { %v741_v45 = vpop.permute.xlu0 %740  ;;  %v739_v57 = vpop.permute.xlu1 %738 }
 0x117   :  { %v1716_v55 = vmul.f32 %v741_v45, %v1435_v20  ;;  %v1719_v54 = vmul.f32 %v739_v57, %v1433_v10  ;;  %v762_v20 = vadd.f32 %v678_v22, %v618_v29  ;;  %1070 = vrcp.f32 %v1713_v48  ;;  %v1063_v45 = vpop.eup %1062 }
 0x118   :  { %v336_v22 = vadd.f32 1.0, %v335_v35  ;;  %v341_v35 = vadd.f32 1.0, %v1747_v51  ;;  %v1065_v59 = vpop.eup %1064  ;;  %v2184_v57 = vmax.f32 %v1571_v41, 0.0 }
 0x119   :  { %v1733_v5 = vsub.f32 %v761_v11, %v1719_v54  ;;  %v1751_v0 = vsub.f32 %v762_v20, %v1716_v55  ;;  %v680_v11 = vmul.f32 %v1644_v16, %v1412_v8  ;;  %v222_v20 = vadd.f32 1.0, %v1063_v45 }
 0x11a   :  { %v829_v28 = vpop.permute.xlu0 %828  ;;  %v827_v25 = vpop.permute.xlu1 %826  ;;  %v1788_v3 = vmul.f32 %v1629_v46, %v336_v22  ;;  %v620_v8 = vmul.f32 %v1663_v24, %v1407_v2  ;;  %v248_v16 = vmul.f32 %v1500_v1, %v1566_v39  ;;  %v223_v4 = vadd.f32 1.0, %v1065_v59 }
 0x11b   :  { %v1754_v29 = vmul.f32 %v829_v28, %v1445_v21  ;;  %v1757_v63 = vmul.f32 %v827_v25, %v1443_v15  ;;  %1072 = vrcp.f32 %v1733_v5  ;;  %v1767_v21 = vmul.f32 0.6931472, %v1055_v53  ;;  %v1790_v28 = vpop.eup %1066 }
 0x11c   :  { %v338_v15 = vand.u32 2147483647, %v1629_v46  ;;  %2177 = vst [vmem:[#allocation21_spill] sm:$0xff] %v1790_v28  ;;  %v392_v46 = vsub.f32 1.0, %v1500_v1  ;;  %v249_v59 = vmul.f32 %v1512_v12, %v1571_v41 }
 0x11d   :  { %1074 = vrcp.f32 %v1754_v29 }
 0x11e   :  { %1076 = vrcp.f32 %v1757_v63  ;;  %v831_v60 = vpop.permute.xlu0 %830  ;;  %v743_v19 = vpop.permute.xlu1 %742  ;;  %vm1798_vm14 = vcmp.lt.f32.partialorder %v338_v15, 0.0004427343  ;;  %v2147_v15 = vsub.f32 1.0, %v1512_v12  ;;  %v257_v38 = vsub.f32 %v2184_v57, %v249_v59 }
 0x11f   :  { %1078 = vrcp.f32 %v1751_v0  ;;  %v1780_v53 = vmul.f32 %v831_v60, %v1455_v43  ;;  %v1783_v32 = vmul.f32 %v743_v19, %v1453_v42  ;;  %v2180_v60 = vmax.f32 %v1566_v39, 0.0 }
 0x120   :  { %1080 = vrcp.f32 %v221_v37  ;;  %v764_v37 = vadd.f32 %v680_v11, %v620_v8  ;;  %v2181_v8 = vsub.f32 1.0, %v1639_v58  ;;  %v2207_v62 = vsel %vm1798_vm14, %v1788_v3, %v1785_v6 }
 0x121   :  { %1082 = vrcp.f32 %v1780_v53  ;;  %v1796_v43 = vsub.f32 %v763_v61, %v1783_v32  ;;  %v1830_v61 = vadd.f32 1.0, %v1790_v28  ;;  %v256_v19 = vsub.f32 %v2180_v60, %v248_v16 }
 0x122   :  { %v745_v9 = vpop.permute.xlu0 %744  ;;  %v833_v25 = vpop.permute.xlu1 %832  ;;  %1084 = vlog2.f32 %v341_v35  ;;  %v376_v35 = vmul.f32 %v1639_v58, %v1500_v1  ;;  %v1852_v60 = vmul.f32 0.25, %v1512_v12  ;;  %v1856_v58 = vmul.f32 0.75, %v392_v46 }
 0x123   :  { %1086 = vrcp.f32 %v1796_v43  ;;  %v1807_v2 = vmul.f32 %v745_v9, %v1472_v23  ;;  %v1810_v24 = vmul.f32 %v833_v25, %v1474_v14  ;;  %v400_v9 = vmul.f32 %v392_v46, %v2181_v8 }
 0x124   :  { %1088 = vrcp.f32 %v222_v20  ;;  %v1838_v20 = vpop.eup %1068  ;;  %v1843_v25 = vmul.f32 0.25, %v1500_v1  ;;  %v2183_v1 = vsub.f32 1.0, %v1642_v13  ;;  %v850_v28 = vsub.f32 %v1757_v63, %v1713_v48  ;;  %v2188_v63 = vld [vmem:[#allocation12_spill] sm:$0xff] }
 0x125   :  { %v1826_v14 = vsub.f32 %v764_v37, %v1807_v2  ;;  %1090 = vrcp.f32 %v1810_v24  ;;  %v1071_v16 = vpop.eup %1070  ;;  %v377_v37 = vmul.f32 %v1642_v13, %v1512_v12  ;;  %v2186_v13 = vsel %vm1696_vm8, %v1694_v49, %v1691_v34 }
 0x126   :  { %v835_v11 = vpop.permute.xlu1 %834  ;;  %1092 = vrcp.f32 %v223_v4  ;;  %v2182_v4 = vld [vmem:[#allocation10_spill] sm:$0xff]  ;;  %v401_v45 = vmul.f32 %v2147_v15, %v2183_v1  ;;  %v1876_v1 = vadd.f32 %v2186_v13, %v256_v19  ;;  %v1881_v57 = vadd.f32 %v400_v9, %v376_v35 }
 0x127   :  { %1094 = vrcp.f32 %v1826_v14  ;;  %v1847_v39 = vmul.f32 %v835_v11, %v1478_v18  ;;  %v250_v23 = vmul.f32 %v2182_v4, %v1576_v56  ;;  %v851_v11 = vsub.f32 %v1754_v29, %v1733_v5 }
 0x128   :  { %v1073_v8 = vpop.eup %1072  ;;  %v378_v5 = vmul.f32 %v1646_v33, %v2182_v4  ;;  %v2187_v46 = vmax.f32 %v1576_v56, 0.0  ;;  %v2150_v36 = vsub.f32 1.0, %v2188_v63  ;;  %v773_v18 = vmul.f32 %v1071_v16, %v1686_v47  ;;  %v747_v16 = vpop.permute.xlu0 %746 }
 0x129   :  { %1096 = vrcp.f32 %v1847_v39  ;;  %v775_v29 = vmul.f32 %v1073_v8, %v1719_v54  ;;  %v2189_v19 = vsub.f32 1.0, %v1646_v33  ;;  %v2190_v13 = vsub.f32 1.0, %v2182_v4 }
 0x12a   :  { %v1075_v22 = vpop.eup %1074  ;;  %v258_v48 = vsub.f32 %v2187_v46, %v250_v23  ;;  %v852_v54 = vsub.f32 %v1780_v53, %v1751_v0  ;;  %v1895_v35 = vadd.f32 %v401_v45, %v377_v37  ;;  %v2191_v23 = vld [vmem:[#allocation14_spill] sm:$0xff]  ;;  %v379_v47 = vmul.f32 %v1656_v52, %v2185_v40 }
 0x12b   :  { %v1077_v15 = vpop.eup %1076  ;;  %v859_v41 = vmul.f32 %v1075_v22, %v851_v11  ;;  %v402_v51 = vmul.f32 %v2190_v13, %v2189_v19  ;;  %v251_v9 = vmul.f32 %v2185_v40, %v2191_v23  ;;  %v2193_v33 = vsub.f32 1.0, %v2185_v40  ;;  %v2194_v0 = vld [vmem:[#allocation6_spill] sm:$0xff] }
 0x12c   :  { %v1079_v59 = vpop.eup %1078  ;;  %v857_v34 = vmul.f32 %v1077_v15, %v850_v28  ;;  %v2192_v28 = vsub.f32 1.0, %v1656_v52  ;;  %v681_v53 = vmul.f32 %v1678_v31, %v2194_v0  ;;  %v380_v52 = vmul.f32 %v1689_v7, %v2188_v63  ;;  %v2197_v31 = vld [vmem:[#allocation5_spill] sm:$0xff] }
 0x12d   :  { %v1887_v49 = vpop.eup %1080  ;;  %v869_v22 = vsub.f32 %v775_v29, %v859_v41  ;;  %v777_v45 = vmul.f32 %v1079_v59, %v1716_v55  ;;  %v2195_v41 = vld [vmem:[#allocation15_spill] sm:$0xff]  ;;  %v2196_v13 = vsub.f32 1.0, %v1689_v7  ;;  %v853_v59 = vsub.f32 %v1810_v24, %v1796_v43 }
 0x12e   :  { %v1083_v56 = vpop.eup %1082  ;;  %v403_v15 = vmul.f32 %v2193_v33, %v2192_v28  ;;  %v868_v8 = vsub.f32 %v773_v18, %v857_v34  ;;  %v252_v19 = vmul.f32 %v2188_v63, %v2195_v41  ;;  %v2198_v33 = vld [vmem:[#allocation19_spill] sm:$0xff]  ;;  %v2200_v0 = vmax.f32 %v2191_v23, 0.0 }
 0x12f   :  { %v1905_v11 = vpop.eup %1084  ;;  %v861_v37 = vmul.f32 %v1083_v56, %v852_v54  ;;  %v881_v46 = vsub.f32 1.0, %v869_v22  ;;  %v404_v18 = vmul.f32 %v2150_v36, %v2196_v13  ;;  %v621_v55 = vmul.f32 %v2198_v33, %v2197_v31  ;;  %v2199_v54 = vld [vmem:[#allocation8_spill] sm:$0xff] }
 0x130   :  { %v1087_v29 = vpop.eup %1086  ;;  %v880_v34 = vsub.f32 1.0, %v868_v8  ;;  %v1925_v22 = vmul.f32 %v747_v16, %v2199_v54  ;;  %v259_v13 = vsub.f32 %v2200_v0, %v251_v9  ;;  %v416_v8 = vsub.f32 1.0, %v1881_v57 }
 0x131   :  { %v1918_v28 = vpop.eup %1088  ;;  %894 = vrot.lane.b32.xlu0 %v881_v46, %s1126_s0  ;;  %v870_v56 = vsub.f32 %v777_v45, %v861_v37  ;;  %v410_v36 = vadd.f32 %v402_v51, %v378_v5  ;;  %v1932_v31 = vadd.f32 %v403_v15, %v379_v47  ;;  %v765_v43 = vadd.f32 %v681_v53, %v621_v55 }
 0x132   :  { %v1091_v7 = vpop.eup %1090  ;;  %892 = vrot.lane.b32.xlu1 %v880_v34, %s1126_s0  ;;  %v779_v24 = vmul.f32 %v1087_v29, %v1783_v32  ;;  %v2201_v23 = vmax.f32 %v2195_v41, 0.0  ;;  %v2202_v34 = vsub.f32 1.0, %v1512_v12  ;;  %v2203_v51 = vsel %vm1728_vm15, %v1707_v30, %v1726_v27 }
 0x133   :  { %v1934_v33 = vpop.eup %1092  ;;  %v863_v16 = vmul.f32 %v1091_v7, %v853_v59  ;;  %v136_v54 = vpop.permute.xlu0 %135  ;;  %v882_v45 = vsub.f32 1.0, %v870_v56  ;;  %v369_v5 = vadd.f32 %v2203_v51, %v257_v38  ;;  %v417_v57 = vsub.f32 1.0, %v1895_v35 }
 0x134   :  { %v96_v46 = vpop.permute.xlu1 %95  ;;  %v1095_v37 = vpop.eup %1094  ;;  %v260_v9 = vsub.f32 %v2201_v23, %v252_v19  ;;  %v449_v0 = vmul.f32 0.75, %v2202_v34  ;;  %v1948_v32 = vsub.f32 %v765_v43, %v1925_v22  ;;  %v854_v47 = vsub.f32 %v1847_v39, %v1826_v14  ;;  %v2212_v23 = vld [vmem:[#allocation16_spill] sm:$0xff] }
 0x135   :  { %v871_v15 = vsub.f32 %v779_v24, %v863_v16  ;;  %v412_v53 = vadd.f32 %v404_v18, %v380_v52  ;;  %v456_v12 = vadd.f32 %v1856_v58, %v1843_v25  ;;  %v424_v17 = vmul.f32 %v416_v8, %v1876_v1  ;;  %v2206_v1 = vld [vmem:[#allocation9_spill] sm:$0xff]  ;;  %v2210_v16 = vld [vmem:[#allocation7_spill] sm:$0xff] }
 0x136   :  { %v1097_v29 = vpop.eup %1096  ;;  %896 = vrot.lane.b32.xlu1 %v882_v45, %s1126_s0  ;;  %v2204_v30 = vsel %vm1735_vm7, %v1710_v26, %v1742_v44  ;;  %v418_v27 = vsub.f32 1.0, %v410_v36  ;;  %v781_v35 = vmul.f32 %v1095_v37, %v1807_v2  ;;  %v2205_v19 = vsel %vm1771_vm13, %v1745_v50, %v1767_v21 }
 0x137   :  { %v370_v38 = vadd.f32 %v2204_v30, %v258_v48  ;;  %v865_v14 = vmul.f32 %v1097_v29, %v854_v47  ;;  %v837_v39 = vpop.permute.xlu0 %836  ;;  %v371_v25 = vadd.f32 %v2205_v19, %v259_v13  ;;  %v419_v58 = vsub.f32 1.0, %v1932_v31 }
 0x138   :  { %v99_v41 = vpop.permute.xlu1 %98  ;;  %v442_v10 = vmul.f32 0.25, %v2182_v4  ;;  %v1970_v52 = vmul.f32 %v837_v39, %v2206_v1  ;;  %v883_v26 = vsub.f32 1.0, %v871_v15  ;;  %v425_v44 = vmul.f32 %v417_v57, %v369_v5 }
 0x139   :  { %1098 = vrcp.f32 %v1948_v32  ;;  %v872_v2 = vsub.f32 %v781_v35, %v865_v14  ;;  %v372_v48 = vadd.f32 %v2207_v62, %v260_v9  ;;  %v420_v50 = vsub.f32 1.0, %v412_v53  ;;  %v2213_v53 = vld [vmem:[#allocation20_spill] sm:$0xff] }
 0x13a   :  { %v443_v21 = vmul.f32 0.25, %v2185_v40  ;;  %1100 = vrcp.f32 %v1970_v52  ;;  %898 = vrot.lane.b32.xlu1 %v883_v26, %s1126_s0  ;;  %v426_v36 = vmul.f32 %v418_v27, %v370_v38  ;;  %v2208_v18 = vsub.f32 1.0, %v2182_v4 }
 0x13b   :  { %v139_v59 = vpop.permute.xlu0 %138  ;;  %v884_v7 = vsub.f32 1.0, %v872_v2  ;;  %v432_v13 = vmul.f32 %v424_v17, %v416_v8  ;;  %v427_v42 = vmul.f32 %v419_v58, %v371_v25  ;;  %v2209_v31 = vsub.f32 1.0, %v2185_v40 }
 0x13c   :  { %v450_v55 = vmul.f32 0.75, %v2208_v18  ;;  %v102_v56 = vpop.permute.xlu1 %101  ;;  %v444_v3 = vmul.f32 0.25, %v2188_v63  ;;  %v457_v43 = vadd.f32 %v449_v0, %v1852_v60  ;;  %v433_v24 = vmul.f32 %v425_v44, %v417_v57 }
 0x13d   :  { %v451_v6 = vmul.f32 0.75, %v2209_v31  ;;  %1102 = vlog2.f32 %v1830_v61  ;;  %vm148_vm0 = vcmp.eq.s32.totalorder %v136_v54, 1  ;;  %vm108_vm1 = vcmp.eq.s32.totalorder %v2210_v16, %v96_v46 }
 0x13e   :  { %v2211_v4 = vsub.f32 1.0, %v2188_v63  ;;  %v428_v37 = vmul.f32 %v420_v50, %v372_v48  ;;  %v245_v8 = vmax.f32 %v2212_v23, 0.0  ;;  %v389_v9 = vsub.f32 1.0, %v1887_v49  ;;  %900 = vrot.lane.b32.xlu1 %v884_v7, %s1126_s0  ;;  %vm156_vm2 = vmand %vm148_vm0, %vm108_vm1 }
 0x13f   :  { %v434_v40 = vmul.f32 %v426_v36, %v418_v27  ;;  %v458_v34 = vadd.f32 %v450_v55, %v442_v10  ;;  %v142_v51 = vpop.permute.xlu0 %141  ;;  %v464_v0 = vmul.f32 %v456_v12, %v432_v13  ;;  %v435_v5 = vmul.f32 %v427_v42, %v419_v58 }
 0x140   :  { %v452_v45 = vmul.f32 0.75, %v2211_v4  ;;  %v1000_v60 = vpop.permute.xlu1 %999  ;;  %v459_v61 = vadd.f32 %v451_v6, %v443_v21  ;;  %v359_v57 = vadd.f32 1.0, %v1838_v20  ;;  %vm149_vm3 = vcmp.eq.s32.totalorder %v139_v59, 1 }
 0x141   :  { %v1002_v63 = vunpack.i.h.bf16 %v1000_v60  ;;  %v1001_v46 = vunpack.i.l.bf16 %v1000_v60  ;;  %v465_v47 = vmul.f32 %v457_v43, %v433_v24  ;;  %v344_v29 = vmul.f32 -0.5, %v2213_v53 }
 0x142   :  { %v460_v15 = vadd.f32 %v452_v45, %v444_v3  ;;  %v347_v17 = vand.u32 2147483647, %v2213_v53  ;;  %v436_v30 = vmul.f32 %v428_v37, %v420_v50  ;;  %vm109_vm4 = vcmp.eq.s32.totalorder %v2210_v16, %v99_v41  ;;  %v2216_v37 = vld [vmem:[#allocation13_spill] sm:$0xff] }
 0x143   :  { %v512_v38 = vmul.f32 %v1001_v46, %v464_v0  ;;  %v513_v12 = vmul.f32 %v1002_v63, %v465_v47  ;;  %v466_v27 = vmul.f32 %v458_v34, %v434_v40  ;;  %v2214_v35 = vmov 0.0   ;;  %vm157_vm5 = vmand %vm149_vm3, %vm109_vm4  ;;  %v1005_v54 = vpop.permute.xlu0 %1004 }
 0x144   :  { %v2000_v14 = vsel %vm156_vm2, 1.0, %v2214_v35  ;;  %vm150_vm9 = vcmp.eq.s32.totalorder %v142_v51, 1  ;;  %v467_v39 = vmul.f32 %v459_v61, %v435_v5  ;;  %v2002_v19 = vpop.permute.xlu1 %1009  ;;  %1104 = vlog2.f32 %v359_v57 }
 0x145   :  { %v520_v25 = vsel %vm167_vm6, %v512_v38, 0.0  ;;  %v521_v58 = vsel %vm167_vm6, %v513_v12, 0.0  ;;  %v1007_v10 = vunpack.i.h.bf16 %v1005_v54  ;;  %v1006_v1 = vunpack.i.l.bf16 %v1005_v54  ;;  %v2217_v12 = vld [vmem:[#allocation17_spill] sm:$0xff] }
 0x146   :  { %v855_v41 = vsub.f32 %v1970_v52, %v1948_v32  ;;  %vm110_vm10 = vcmp.eq.s32.totalorder %v2210_v16, %v102_v56  ;;  %v522_v26 = vadd.f32 %v521_v58, %v520_v25  ;;  %v468_v44 = vmul.f32 %v460_v15, %v436_v30  ;;  %v1099_v2 = vpop.eup %1098  ;;  %v2215_v32 = vld [vmem:[#allocation21_spill] sm:$0xff] }
 0x147   :  { %v2010_v62 = vsel %vm157_vm5, 1.0, %v2214_v35  ;;  %v514_v48 = vmul.f32 %v1006_v1, %v466_v27  ;;  %v515_v50 = vmul.f32 %v1007_v10, %v467_v39  ;;  %v1011_v21 = vunpack.i.l.bf16 %v2002_v19  ;;  %v1101_v36 = vpop.eup %1100  ;;  %vm158_vm11 = vmand %vm150_vm9, %vm110_vm10 }
 0x148   :  { %v390_v18 = vsub.f32 1.0, %v1918_v28  ;;  %v391_v55 = vsub.f32 1.0, %v1934_v33  ;;  %v353_v52 = vmul.f32 -0.5, %v2215_v32  ;;  %v177_v59 = vsel %vm167_vm6, %v2000_v14, 0.0 }
 0x149   :  { %v397_v56 = vsub.f32 1.0, %v2000_v14  ;;  %v867_v7 = vmul.f32 %v1101_v36, %v855_v41  ;;  %v523_v13 = vsel %vm167_vm6, %v514_v48, 0.0  ;;  %v516_v42 = vmul.f32 %v1011_v21, %v468_v44 }
 0x14a   :  { %v1103_v31 = vpop.eup %1102  ;;  %v783_v6 = vmul.f32 %v1099_v2, %v1925_v22  ;;  %v524_v3 = vadd.f32 %v523_v13, %v522_v26  ;;  %v345_v43 = vadd.f32 1.0, %v344_v29  ;;  %v179_v24 = vsel %vm167_vm6, %v2010_v62, 0.0  ;;  %v2222_v2 = vld [vmem:[#allocation18_spill] sm:$0xff] }
 0x14b   :  { %v398_v16 = vsub.f32 1.0, %v2010_v62  ;;  %v2026_v4 = vsel %vm158_vm11, 1.0, %v2214_v35  ;;  %v525_v45 = vsel %vm167_vm6, %v515_v50, 0.0  ;;  %v178_v40 = vadd.f32 %v177_v59, %v2216_v37 }
 0x14c   :  { %v526_v34 = vadd.f32 %v525_v45, %v524_v3  ;;  %v356_v51 = vand.u32 2147483647, %v2215_v32  ;;  %v362_v60 = vmul.f32 -0.5, %v1838_v20  ;;  %v873_v22 = vsub.f32 %v783_v6, %v867_v7 }
 0x14d   :  { %v405_v0 = vmul.f32 %v397_v56, %v389_v9  ;;  %v527_v5 = vsel %vm167_vm6, %v516_v42, 0.0  ;;  %v354_v61 = vadd.f32 1.0, %v353_v52  ;;  %v180_v57 = vadd.f32 %v179_v24, %v178_v40 }
 0x14e   :  { %v253_v63 = vmul.f32 %v2000_v14, %v2212_v23  ;;  %v2039_v46 = vadd.f32 %v527_v5, %v526_v34  ;;  %v885_v47 = vsub.f32 1.0, %v873_v22  ;;  %v181_v15 = vsel %vm167_vm6, %v2026_v4, 0.0 }
 0x14f   :  { %v381_v29 = vmul.f32 %v1887_v49, %v2000_v14  ;;  %v406_v30 = vmul.f32 %v398_v16, %v390_v18  ;;  %v399_v38 = vsub.f32 1.0, %v2026_v4  ;;  %v182_v9 = vadd.f32 %v181_v15, %v180_v57  ;;  %v1015_v57 = vpop.permute.xlu0 %1014 }
 0x150   :  { %v246_v27 = vmax.f32 %v2217_v12, 0.0  ;;  %v343_v35 = vmul.f32 0.6931472, %v1905_v11  ;;  %v346_v54 = vmul.f32 %v2213_v53, %v345_v43  ;;  %902 = vrot.lane.b32.xlu1 %v885_v47, %s1126_s0  ;;  %v254_v25 = vmul.f32 %v2010_v62, %v2217_v12 }
 0x151   :  { %v1105_v39 = vpop.eup %1104  ;;  %v382_v58 = vmul.f32 %v1918_v28, %v2010_v62  ;;  %vm2056_vm12 = vcmp.lt.f32.partialorder %v347_v17, 0.0004427343  ;;  %v413_v10 = vadd.f32 %v405_v0, %v381_v29  ;;  %183 = vadd.xlane.f32.xlu0 %v182_v9  ;;  %v352_v11 = vmul.f32 0.6931472, %v1103_v31 }
 0x152   :  { %v355_v1 = vmul.f32 %v2215_v32, %v354_v61  ;;  %vm2061_vm8 = vcmp.lt.f32.partialorder %v356_v51, 0.0004427343  ;;  %v363_v26 = vadd.f32 1.0, %v362_v60  ;;  %v261_v44 = vsub.f32 %v245_v8, %v253_v63 }
 0x153   :  { %v407_v28 = vmul.f32 %v399_v38, %v391_v55  ;;  %v365_v53 = vand.u32 2147483647, %v1838_v20  ;;  %v414_v17 = vadd.f32 %v406_v30, %v382_v58  ;;  %v247_v48 = vmax.f32 %v2222_v2, 0.0  ;;  %v556_v58 = vld [vmem:[%s2119_s4] sm:$0xff] }
 0x154   :  { %v349_v50 = vsel %vm2056_vm12, %v346_v54, %v343_v35  ;;  %v262_v21 = vsub.f32 %v246_v27, %v254_v25  ;;  %v255_v36 = vmul.f32 %v2026_v4, %v2222_v2  ;;  %v383_v18 = vmul.f32 %v1934_v33, %v2026_v4  ;;  %v557_v25 = vld [vmem:[%s2119_s4 + $0x8] sm:$0xff] }
 0x155   :  { %v421_v32 = vsub.f32 1.0, %v413_v10  ;;  %v358_v23 = vsel %vm2061_vm8, %v355_v1, %v352_v11  ;;  %v361_v8 = vmul.f32 0.6931472, %v1105_v39  ;;  %v364_v55 = vmul.f32 %v1838_v20, %v363_v26  ;;  %v559_v11 = vld [vmem:[%s2119_s4 + $0x18] sm:$0xff]  ;;  %v560_v26 = vld [vmem:[%s2119_s4 + $0x20] sm:$0xff] }
 0x156   :  { %v373_v52 = vadd.f32 %v349_v50, %v261_v44  ;;  %vm366_vm15 = vcmp.lt.f32.partialorder %v365_v53, 0.0004427343  ;;  %v415_v59 = vadd.f32 %v407_v28, %v383_v18  ;;  %v422_v7 = vsub.f32 1.0, %v414_v17 }
 0x157   :  { %v263_v13 = vsub.f32 %v247_v48, %v255_v36  ;;  %v374_v31 = vadd.f32 %v358_v23, %v262_v21  ;;  %v367_v6 = vsel %vm366_vm15, %v364_v55, %v361_v8  ;;  %v453_v3 = vmul.f32 0.75, %v397_v56  ;;  %v561_v36 = vld [vmem:[%s2119_s4 + $0x28] sm:$0xff] }
 0x158   :  { %v429_v42 = vmul.f32 %v421_v32, %v373_v52  ;;  %v423_v43 = vsub.f32 1.0, %v415_v59  ;;  %v445_v24 = vmul.f32 0.25, %v2000_v14  ;;  %v454_v40 = vmul.f32 0.75, %v398_v16 }
 0x159   :  { %v430_v33 = vmul.f32 %v422_v7, %v374_v31  ;;  %v375_v37 = vadd.f32 %v367_v6, %v263_v13  ;;  %v446_v20 = vmul.f32 0.25, %v2010_v62  ;;  %v1012_v22 = vunpack.i.h.bf16 %v2002_v19 }
 0x15a   :  { %v437_v45 = vmul.f32 %v429_v42, %v421_v32  ;;  %v461_v34 = vadd.f32 %v453_v3, %v445_v24  ;;  %v455_v5 = vmul.f32 0.75, %v399_v38  ;;  %v447_v56 = vmul.f32 0.25, %v2026_v4 }
 0x15b   :  { %v431_v51 = vmul.f32 %v423_v43, %v375_v37  ;;  %v438_v60 = vmul.f32 %v430_v33, %v422_v7  ;;  %v462_v61 = vadd.f32 %v454_v40, %v446_v20  ;;  %v1016_v14 = vunpack.i.l.bf16 %v1015_v57 }
 0x15c   :  { %v469_v0 = vmul.f32 %v461_v34, %v437_v45  ;;  %v463_v29 = vadd.f32 %v455_v5, %v447_v56  ;;  %v1017_v9 = vunpack.i.h.bf16 %v1015_v57  ;;  %vm875_vm7 = vcmp.gt.f32.partialorder %v557_v25, 0.0 }
 0x15d   :  { %v439_v63 = vmul.f32 %v431_v51, %v423_v43  ;;  %v470_v47 = vmul.f32 %v462_v61, %v438_v60  ;;  %vm874_vm13 = vcmp.gt.f32.partialorder %v556_v58, 0.0  ;;  %vm916_vm14 = vcmask 7168  }
 0x15e   :  { %v517_v15 = vmul.f32 %v1012_v22, %v469_v0  ;;  %vm877_vm0 = vcmp.gt.f32.partialorder %v559_v11, 0.0  ;;  %vm878_vm1 = vcmp.gt.f32.partialorder %v560_v26, 0.0  ;;  %vm879_vm2 = vcmp.gt.f32.partialorder %v561_v36, 0.0 }
 0x15f   :  { %v471_v30 = vmul.f32 %v463_v29, %v439_v63  ;;  %v518_v16 = vmul.f32 %v1016_v14, %v470_v47 }
 0x160   :  { %v529_v62 = vsel %vm167_vm6, %v517_v15, 0.0 }
 0x161   :  { %v530_v12 = vadd.f32 %v529_v62, %v2039_v46  ;;  %v519_v27 = vmul.f32 %v1017_v9, %v471_v30  ;;  %v531_v19 = vsel %vm167_vm6, %v518_v16, 0.0  ;;  %v558_v46 = vld [vmem:[%s2119_s4 + $0x10] sm:$0xff] }
 0x163   :  { %v532_v38 = vadd.f32 %v531_v19, %v530_v12  ;;  %v533_v35 = vsel %vm167_vm6, %v519_v27, 0.0  ;;  %vm876_vm6 = vcmp.gt.f32.partialorder %v558_v46, 0.0 }
 0x165   :  { %v534_v54 = vadd.f32 %v533_v35, %v532_v38 }
 0x174   :  { %535 = vadd.xlane.f32.xlu1 %v534_v54 }
 0x1a3   :  { %v895_v49 = vpop.permute.xlu0 %894 }
 0x1a4   :  { %v893_v4 = vpop.permute.xlu1 %892  ;;  %v911_v1 = vsel %vm875_vm7, %v895_v49, 0.0 }
 0x1a5   :  { %v910_v41 = vsel %vm874_vm13, %v893_v4, 0.0  ;;  %v918_v28 = vsel %vm916_vm14, %v911_v1, 0.0 }
 0x1a6   :  { %v917_v53 = vsel %vm916_vm14, %v910_v41, 0.0 }
 0x1a7   :  { %v919_v50 = vadd.f32 %v918_v28, %v917_v53 }
 0x1a8   :  { %v897_v39 = vpop.permute.xlu1 %896 }
 0x1a9   :  { %v912_v44 = vsel %vm876_vm6, %v897_v39, 0.0 }
 0x1aa   :  { %v920_v48 = vsel %vm916_vm14, %v912_v44, 0.0 }
 0x1ab   :  { %v921_v32 = vadd.f32 %v920_v48, %v919_v50 }
 0x1ac   :  { %v899_v10 = vpop.permute.xlu1 %898 }
 0x1ad   :  { %v913_v2 = vsel %vm877_vm0, %v899_v10, 0.0 }
 0x1ae   :  { %v922_v18 = vsel %vm916_vm14, %v913_v2, 0.0 }
 0x1af   :  { %v923_v8 = vadd.f32 %v922_v18, %v921_v32 }
 0x1b0   :  { %v901_v17 = vpop.permute.xlu1 %900 }
 0x1b1   :  { %v914_v21 = vsel %vm878_vm1, %v901_v17, 0.0 }
 0x1b2   :  { %v924_v23 = vsel %vm916_vm14, %v914_v21, 0.0 }
 0x1b3   :  { %v925_v52 = vadd.f32 %v924_v23, %v923_v8 }
 0x1c2   :  { %v903_v55 = vpop.permute.xlu1 %902 }
 0x1c3   :  { %v915_v59 = vsel %vm879_vm2, %v903_v55, 0.0 }
 0x1c4   :  { %v926_v7 = vsel %vm916_vm14, %v915_v59, 0.0 }
 0x1c5   :  { %v927_v13 = vadd.f32 %v926_v7, %v925_v52 }
 0x1c7   :  { %928 = vadd.xlane.f32.xlu0 %v927_v13 }
 0x1da   :  { %v184_v42 = vpop.xlane.xlu0 %183 }
 0x1db   :  { %v185_v31 = vrot.slane %v184_v42, 4 }
 0x1dd   :  { %v186_v6 = vadd.f32 %v185_v31, %v184_v42 }
 0x1df   :  { %v187_v3 = vrot.slane %v186_v6, 2 }
 0x1e1   :  { %v188_v43 = vadd.f32 %v187_v3, %v186_v6 }
 0x1e3   :  { %v189_v33 = vrot.slane %v188_v43, 1 }
 0x1e5   :  { %v190_v24 = vadd.f32 %v189_v33, %v188_v43 }
 0x1e7   :  { %981 = vpush %v190_v24 }
 0x1fd   :  { %v536_v45 = vpop.xlane.xlu1 %535 }
 0x1fe   :  { %v537_v37 = vrot.slane %v536_v45, 4 }
 0x200   :  { %v538_v40 = vadd.f32 %v537_v37, %v536_v45 }
 0x202   :  { %v539_v20 = vrot.slane %v538_v40, 2 }
 0x204   :  { %v540_v34 = vadd.f32 %v539_v20, %v538_v40 }
 0x206   :  { %v541_v51 = vrot.slane %v540_v34, 1 }
 0x208   :  { %v542_v60 = vadd.f32 %v541_v51, %v540_v34 }
 0x20a   :  { %983 = vpush %v542_v60 }
 0x218   :  { %s982_s4 = spop %981 }
 0x219   :  { %s937_s8 = smax.f32 %s1127_s1, %s982_s4 }
 0x21a   :  { %v938_v22 = vstv %s937_s8 }
 0x21b   :  { %1106 = vrcp.f32 %v938_v22 }
 0x228   :  { %v1107_v15 = vpop.eup %1106 }
 0x23b   :  { %s984_s9 = spop %983 }
 0x250   :  { %v929_v0 = vpop.xlane.xlu0 %928 }
 0x251   :  { %v930_v5 = vrot.slane %v929_v0, 4 }
 0x253   :  { %v931_v61 = vadd.f32 %v930_v5, %v929_v0 }
 0x255   :  { %v932_v57 = vrot.slane %v931_v61, 2 }
 0x257   :  { %v933_v56 = vadd.f32 %v932_v57, %v931_v61 }
 0x259   :  { %v934_v63 = vrot.slane %v933_v56, 1 }
 0x25b   :  { %v935_v47 = vadd.f32 %v934_v63, %v933_v56 }
 0x25d   :  { %985 = vpush %v935_v47 }
 0x25e   :  { %987 = vpush %v1107_v15 }
 0x28e   :  { %s986_s10 = spop %985 }
 0x28f   :  { %s988_s14 = spop %987 }
 0x290   :  { %s941_s15 = smul.f32 %s988_s14, %s984_s9 }
 0x291   :  { %s947_s16 = smul.f32 %s988_s14, %s986_s10 }
 0x292   :  { %943 = sst [smem:[#allocation2]] %s941_s15 }
 0x293   :  { %949 = sst [smem:[#allocation2 + $0x1]] %s947_s16 }
 0x294   :  { %1119 = shalt.err (!%p1116_p4)
}
 0x295   :  { %s1128_s2 = smov [#allocation2]  }
 0x296   :  { %959 = dma.smem_to_vmem %s1128_s2, 16, %s957_s13, [#allocation3]  }
 0x297   :  { %1120 = dma.done.wait [#allocation3], 16  }
 0x298   :  { %1121 = vsyncadd [#allocation3], 4294967280 }
 0x299   :  { %963 = sfence }
 0x29a   :  { %964 = vsyncpa [#allocation3], 1 }

</bundles_post_ra>
